<compile_context>
chip_gen: v6e
topology: v6e:2x2x1
jax: 0.10.0
libtpu: 0.0.40
codegen_flags: <defaults>
</compile_context>

<pallas_src>
import math
import functools

import jax
import jax.numpy as jnp
from jax import lax
from jax.experimental import pallas as pl
from jax.experimental.pallas import tpu as pltpu


def _attention_block_kernel(x_ref, gt_ref, gcg_ref, wqkv_ref, bqkv_ref,
                            wp_ref, bp_ref, o_ref, h_ref,
                            *, num_heads: int, eps: float, q_tile: int):
    """Fused AttentionBlock forward for a block of `bb` batch elements.

    x_ref   : (bb, C, HW) f32   activations, channel-major (spatial in lanes)
    gt_ref  : (G, C)      f32   one-hot group<-channel matrix (GroupNorm reduce)
    gcg_ref : (C, G)      f32   one-hot channel<-group matrix (broadcast back)
    wqkv_ref: (3C, C)     bf16  fused qkv weight (gamma + softmax scale folded)
    bqkv_ref: (3C, 1)     f32   fused qkv bias   (beta  + softmax scale folded)
    wp_ref  : (C, C)      bf16  output projection weight (PyTorch (out, in) layout)
    bp_ref  : (C, 1)      f32   output projection bias
    o_ref   : (bb, C, HW) f32   output block
    h_ref   : (C, HW)     f32   VMEM scratch slab holding all head outputs
    """
    bb, C, HW = x_ref.shape
    num_groups = gt_ref.shape[0]
    d = C // num_heads
    inv_n = 1.0 / float(HW * (C // num_groups))
    n_q = HW // q_tile

    wqkv = wqkv_ref[...]          # (3C, C) bf16
    bqkv = bqkv_ref[...]          # (3C, 1) f32
    wp = wp_ref[...]              # (C, C)  bf16
    bp = bp_ref[...]              # (C, 1)  f32
    gt = gt_ref[...]              # (G, C)  f32
    gcg = gcg_ref[...]            # (C, G)  f32

    for b in range(bb):
        x = x_ref[b]                                          # (C, HW) f32

        # ---- GroupNorm statistics (affine is folded into the qkv weights) ----
        s1 = jnp.sum(x, axis=1, keepdims=True)                # (C, 1)
        s2 = jnp.sum(x * x, axis=1, keepdims=True)            # (C, 1)
        gs1 = jnp.dot(gt, s1, preferred_element_type=jnp.float32)   # (G, 1)
        gs2 = jnp.dot(gt, s2, preferred_element_type=jnp.float32)   # (G, 1)
        gmean = gs1 * inv_n
        gvar = jnp.maximum(gs2 * inv_n - gmean * gmean, 0.0)  # clamp cancellation
        ginv = lax.rsqrt(gvar + eps)
        mean_c = jnp.dot(gcg, gmean, preferred_element_type=jnp.float32)  # (C, 1)
        inv_c = jnp.dot(gcg, ginv, preferred_element_type=jnp.float32)    # (C, 1)
        xn = ((x - mean_c) * inv_c).astype(jnp.bfloat16)      # (C, HW) bf16

        # ---- fused QKV: single wide bf16 MXU pass, f32 accumulation ----
        qkv = jnp.dot(wqkv, xn, preferred_element_type=jnp.float32) + bqkv  # (3C, HW)
        qkv = qkv.astype(jnp.bfloat16)

        # ---- multi-head attention; heads land in a VMEM slab (no concat) ----
        # TODO(synk): for very large HW (e.g. 64x64 images with C=512) switch the
        # inner loop to online-softmax flash tiling over KV tiles so the (C, HW)
        # K/V slabs and (q_tile, HW) scores stay inside v7x's 64 MiB VMEM.
        for h in range(num_heads):
            k_h = qkv[C + h * d:C + (h + 1) * d, :]           # (d, HW) bf16
            v_h = qkv[2 * C + h * d:2 * C + (h + 1) * d, :]   # (d, HW) bf16
            for qi in range(n_q):
                q0 = qi * q_tile
                q_h = qkv[h * d:(h + 1) * d, q0:q0 + q_tile]  # (d, tq) bf16
                # scores: keys in sublanes, queries in lanes -> (HW, tq)
                s = lax.dot_general(k_h, q_h, (((0,), (0,)), ((), ())),
                                    preferred_element_type=jnp.float32)
                m = jnp.max(s, axis=0, keepdims=True)         # (1, tq)
                p = jnp.exp(s - m)                            # (HW, tq) f32
                denom = jnp.sum(p, axis=0, keepdims=True)     # (1, tq)
                # PV first, softmax normalization after (EUP reciprocal)
                o_un = jnp.dot(v_h, p.astype(jnp.bfloat16),
                               preferred_element_type=jnp.float32)  # (d, tq)
                o_h = o_un * pl.reciprocal(denom, approx=True)
                h_ref[h * d:(h + 1) * d, q0:q0 + q_tile] = o_h

        # ---- output projection + residual; one (C,C)@(C,HW) MXU pass ----
        attn = h_ref[...].astype(jnp.bfloat16)                # (C, HW)
        out = jnp.dot(wp, attn, preferred_element_type=jnp.float32) + bp + x
        o_ref[b] = out.astype(o_ref.dtype)


def _const_block_spec(shape):
    """Whole-array, grid-invariant parameter block; single-buffered if supported."""
    index_map = lambda i: (0,) * len(shape)
    try:
        return pl.BlockSpec(shape, index_map, pipeline_mode=pl.Buffered(1))
    except (TypeError, AttributeError):      # older JAX without pipeline_mode
        return pl.BlockSpec(shape, index_map)


def _pick_q_tile(hw):
    if hw <= 512:
        return hw
    for t in (512, 256, 128):
        if hw % t == 0:
            return t
    return hw


def _pick_batch_block(B, C, HW):
    if B <= 2:
        return 1                      # keep >= 2 grid steps for v7x megacore
    bb = B // 2
    while bb > 1 and (B % bb != 0 or bb * C * HW * 4 * 8 > (16 << 20)):
        bb -= 1
    return max(bb, 1)


def _vmem_limit_bytes(bb, C, HW, q_tile):
    f32, bf16 = 4, 2
    act = 2 * 2 * bb * C * HW * f32                       # x + out blocks, 2-buffered
    params = (3 * C * C + C * C) * bf16 + 4 * C * f32 + 16 * C * f32
    inter = (C * HW * (f32 + bf16)             # xn
             + 3 * C * HW * (f32 + bf16)       # qkv f32 + bf16
             + 2 * HW * q_tile * f32           # scores + probs
             + C * HW * f32)                   # head slab scratch
    est = act + params + inter
    return int(min(110 << 20, max(32 << 20, 2 * est)))


def attention_block_forward(x, gamma, beta, qkv_w, qkv_b, proj_w, proj_b,
                            *, num_heads: int = 4, num_groups: int = 8,
                            eps: float = 1e-5, batch_block=None, q_tile=None,
                            interpret: bool = False):
    """Pallas TPU forward pass equivalent to AttentionBlock.forward.

    x: (B, C, H, W) f32.  qkv_w: (3C, C), proj_w: (C, C) — squeezed 1x1-conv
    weights in PyTorch (out_ch, in_ch) layout.  Returns (B, C, H, W) f32.
    """
    B, C, H, W = x.shape
    assert C % num_heads == 0, "channels must divide num_heads"
    assert C % num_groups == 0, "channels must divide num_groups"
    HW = H * W
    d = C // num_heads

    # ---- wrapper-side weight folding (exact; layout plumbing only) ----
    gamma_f = gamma.reshape(C).astype(jnp.float32)
    beta_f = beta.reshape(C).astype(jnp.float32)
    w = qkv_w.reshape(3 * C, C).astype(jnp.float32)
    bvec = qkv_b.reshape(3 * C).astype(jnp.float32)
    # W @ (xn*gamma + beta) + b == (W*gamma) @ xn + (W@beta + b)
    b_fold = bvec + w @ beta_f
    w_fold = w * gamma_f[None, :]
    # fold the 1/sqrt(d) softmax scale into the q projection rows
    scale = 1.0 / math.sqrt(d)
    row_scale = jnp.concatenate([jnp.full((C,), scale, jnp.float32),
                                 jnp.ones((2 * C,), jnp.float32)])
    w_fold = w_fold * row_scale[:, None]
    b_fold = b_fold * row_scale

    wqkv_bf = w_fold.astype(jnp.bfloat16)                     # (3C, C)
    bqkv = b_fold.reshape(3 * C, 1)                           # (3C, 1) f32
    wp_bf = proj_w.reshape(C, C).astype(jnp.bfloat16)         # (C, C)
    bp = proj_b.reshape(C, 1).astype(jnp.float32)             # (C, 1)

    g_size = C // num_groups
    gt = (jnp.arange(num_groups)[:, None] ==
          (jnp.arange(C)[None, :] // g_size)).astype(jnp.float32)   # (G, C)
    gcg = gt.T                                                        # (C, G)

    # Channel-major activations: plain reshape, no HBM transpose either way.
    x3 = x.reshape(B, C, HW).astype(jnp.float32)

    if batch_block is None:
        batch_block = _pick_batch_block(B, C, HW)
    assert B % batch_block == 0
    if q_tile is None:
        q_tile = _pick_q_tile(HW)
    assert HW % q_tile == 0

    kernel = functools.partial(_attention_block_kernel, num_heads=num_heads,
                               eps=eps, q_tile=q_tile)

    out = pl.pallas_call(
        kernel,
        out_shape=jax.ShapeDtypeStruct((B, C, HW), jnp.float32),
        grid_spec=pltpu.PrefetchScalarGridSpec(
            num_scalar_prefetch=0,
            grid=(B // batch_block,),
            in_specs=[
                pl.BlockSpec((batch_block, C, HW), lambda i: (i, 0, 0)),  # x
                _const_block_spec((num_groups, C)),                       # gt
                _const_block_spec((C, num_groups)),                       # gcg
                _const_block_spec((3 * C, C)),                            # wqkv
                _const_block_spec((3 * C, 1)),                            # bqkv
                _const_block_spec((C, C)),                                # wp
                _const_block_spec((C, 1)),                                # bp
            ],
            out_specs=pl.BlockSpec((batch_block, C, HW), lambda i: (i, 0, 0)),
            scratch_shapes=[pltpu.VMEM((C, HW), jnp.float32)],            # head slab
        ),
        compiler_params=pltpu.CompilerParams(
            dimension_semantics=("parallel",),   # batch axis -> megacore split
            vmem_limit_bytes=_vmem_limit_bytes(batch_block, C, HW, q_tile),
        ),
        interpret=interpret,
    )(x3, gt, gcg, wqkv_bf, bqkv, wp_bf, bp)

    return out.reshape(B, C, H, W)


def _reference(x, gamma, beta, qkv_w, qkv_b, proj_w, proj_b,
               num_heads, num_groups, eps=1e-5):
    """Pure-JAX mirror of the PyTorch AttentionBlock.forward (channel-first)."""
    hi = jax.lax.Precision.HIGHEST
    B, C, H, W = x.shape
    HW = H * W
    g = C // num_groups
    d = C // num_heads
    xr = x.reshape(B, num_groups, g, HW).astype(jnp.float32)
    mean = xr.mean(axis=(2, 3), keepdims=True)
    var = ((xr - mean) ** 2).mean(axis=(2, 3), keepdims=True)
    xn = ((xr - mean) / jnp.sqrt(var + eps)).reshape(B, C, HW)
    xn = xn * gamma[None, :, None] + beta[None, :, None]
    qkv = jnp.einsum('oc,bcs->bos', qkv_w, xn, precision=hi) + qkv_b[None, :, None]
    q, k, v = qkv[:, :C], qkv[:, C:2 * C], qkv[:, 2 * C:]
    qh = q.reshape(B, num_heads, d, HW).transpose(0, 1, 3, 2)   # (B, h, HW, d)
    kh = k.reshape(B, num_heads, d, HW)                          # (B, h, d, HW)
    vh = v.reshape(B, num_heads, d, HW).transpose(0, 1, 3, 2)    # (B, h, HW, d)
    attn = jnp.einsum('bhid,bhdj->bhij', qh, kh, precision=hi) * (d ** -0.5)
    attn = jax.nn.softmax(attn, axis=-1)
    o = jnp.einsum('bhij,bhjd->bhid', attn, vh, precision=hi)    # (B, h, HW, d)
    o = o.transpose(0, 1, 3, 2).reshape(B, C, HW)
    out = (jnp.einsum('oc,bcs->bos', proj_w, o, precision=hi)
           + proj_b[None, :, None] + x.reshape(B, C, HW))
    return out.reshape(B, C, H, W)


if __name__ == "__main__":
    B, C, H, W = 2, 32, 8, 8            # GroupNorm(8) and num_heads=4 need C % 8 == 0
    num_heads, num_groups = 4, 8

    key = jax.random.PRNGKey(0)
    ks = jax.random.split(key, 7)
    x = jax.random.normal(ks[0], (B, C, H, W), dtype=jnp.float32)
    gamma = 1.0 + 0.1 * jax.random.normal(ks[1], (C,), dtype=jnp.float32)
    beta = 0.1 * jax.random.normal(ks[2], (C,), dtype=jnp.float32)
    w_scale = 1.0 / math.sqrt(C)
    qkv_w = w_scale * jax.random.normal(ks[3], (3 * C, C), dtype=jnp.float32)
    qkv_b = w_scale * jax.random.normal(ks[4], (3 * C,), dtype=jnp.float32)
    proj_w = w_scale * jax.random.normal(ks[5], (C, C), dtype=jnp.float32)
    proj_b = w_scale * jax.random.normal(ks[6], (C,), dtype=jnp.float32)

    out = attention_block_forward(x, gamma, beta, qkv_w, qkv_b, proj_w, proj_b,
                                  num_heads=num_heads, num_groups=num_groups)
    out = jax.block_until_ready(out)

    ref = _reference(x, gamma, beta, qkv_w, qkv_b, proj_w, proj_b,
                     num_heads, num_groups)
    assert out.shape == (B, C, H, W), out.shape
    max_err = float(jnp.max(jnp.abs(out - ref)))
    # bf16 MXU operands + approx reciprocal vs an f32-highest reference.
    assert max_err < 3e-2, f"mismatch vs reference: max_abs_err={max_err}"

    print("KERNEL_OK")
</pallas_src>

<mosaic_0001>
module attributes {stable_mosaic.version = 11 : i64} {
  func.func @_attention_block_kernel(%arg0: i32, %arg1: memref<1x32x64xf32, #tpu.memory_space<vmem>>, %arg2: memref<8x32xf32, #tpu.memory_space<vmem>>, %arg3: memref<32x8xf32, #tpu.memory_space<vmem>>, %arg4: memref<96x32xbf16, #tpu.memory_space<vmem>>, %arg5: memref<96x1xf32, #tpu.memory_space<vmem>>, %arg6: memref<32x32xbf16, #tpu.memory_space<vmem>>, %arg7: memref<32x1xf32, #tpu.memory_space<vmem>>, %arg8: memref<1x32x64xf32, #tpu.memory_space<vmem>>, %arg9: memref<32x64xf32, #tpu.memory_space<vmem>>) attributes {dimension_semantics = [#tpu.dimension_semantics<parallel>], iteration_bounds = array<i64: 2>, scalar_prefetch = 0 : i64, scratch_operands = 1 : i64, tpu.core_type = #tpu.core_type<tc>, window_params = [{transform_indices = @transform_0, window_bounds = array<i64: 1, 32, 64>}, {pipeline_mode = #tpu.pipeline_mode<synchronous>, transform_indices = @transform_1, window_bounds = array<i64: 8, 32>}, {pipeline_mode = #tpu.pipeline_mode<synchronous>, transform_indices = @transform_2, window_bounds = array<i64: 32, 8>}, {pipeline_mode = #tpu.pipeline_mode<synchronous>, transform_indices = @transform_3, window_bounds = array<i64: 96, 32>}, {pipeline_mode = #tpu.pipeline_mode<synchronous>, transform_indices = @transform_4, window_bounds = array<i64: 96, 1>}, {pipeline_mode = #tpu.pipeline_mode<synchronous>, transform_indices = @transform_5, window_bounds = array<i64: 32, 32>}, {pipeline_mode = #tpu.pipeline_mode<synchronous>, transform_indices = @transform_6, window_bounds = array<i64: 32, 1>}, {transform_indices = @transform_7, window_bounds = array<i64: 1, 32, 64>}]} {
    %c0 = arith.constant 0 : index
    %c0_0 = arith.constant 0 : index
    %0 = vector.load %arg4[%c0, %c0_0] : memref<96x32xbf16, #tpu.memory_space<vmem>>, vector<96x32xbf16>
    %c0_1 = arith.constant 0 : index
    %c0_2 = arith.constant 0 : index
    %1 = vector.load %arg5[%c0_1, %c0_2] : memref<96x1xf32, #tpu.memory_space<vmem>>, vector<96x1xf32>
    %c0_3 = arith.constant 0 : index
    %c0_4 = arith.constant 0 : index
    %2 = vector.load %arg6[%c0_3, %c0_4] : memref<32x32xbf16, #tpu.memory_space<vmem>>, vector<32x32xbf16>
    %c0_5 = arith.constant 0 : index
    %c0_6 = arith.constant 0 : index
    %3 = vector.load %arg7[%c0_5, %c0_6] : memref<32x1xf32, #tpu.memory_space<vmem>>, vector<32x1xf32>
    %c0_7 = arith.constant 0 : index
    %c0_8 = arith.constant 0 : index
    %4 = vector.load %arg2[%c0_7, %c0_8] : memref<8x32xf32, #tpu.memory_space<vmem>>, vector<8x32xf32>
    %c0_9 = arith.constant 0 : index
    %c0_10 = arith.constant 0 : index
    %5 = vector.load %arg3[%c0_9, %c0_10] : memref<32x8xf32, #tpu.memory_space<vmem>>, vector<32x8xf32>
    %c0_11 = arith.constant 0 : index
    %c0_12 = arith.constant 0 : index
    %c0_13 = arith.constant 0 : index
    %6 = vector.load %arg1[%c0_11, %c0_12, %c0_13] : memref<1x32x64xf32, #tpu.memory_space<vmem>>, vector<1x32x64xf32>
    %7 = vector.shape_cast %6 : vector<1x32x64xf32> to vector<32x64xf32>
    %cst = arith.constant dense<0.000000e+00> : vector<32xf32>
    %8 = vector.multi_reduction <add>, %7, %cst [1] : vector<32x64xf32> to vector<32xf32>
    %9 = vector.shape_cast %8 : vector<32xf32> to vector<32x1xf32>
    %10 = arith.mulf %7, %7 : vector<32x64xf32>
    %cst_14 = arith.constant dense<0.000000e+00> : vector<32xf32>
    %11 = vector.multi_reduction <add>, %10, %cst_14 [1] : vector<32x64xf32> to vector<32xf32>
    %12 = vector.shape_cast %11 : vector<32xf32> to vector<32x1xf32>
    %cst_15 = arith.constant dense<0.000000e+00> : vector<8x1xf32>
    %13 = tpu.matmul %4, %9, %cst_15 {dimension_numbers = #tpu.dot_dimension_numbers<[1], [0], [0], [1], [0, 0, 1, 1], [], []>} : vector<8x32xf32>, vector<32x1xf32>, vector<8x1xf32> -> vector<8x1xf32>
    %cst_16 = arith.constant dense<0.000000e+00> : vector<8x1xf32>
    %14 = tpu.matmul %4, %12, %cst_16 {dimension_numbers = #tpu.dot_dimension_numbers<[1], [0], [0], [1], [0, 0, 1, 1], [], []>} : vector<8x32xf32>, vector<32x1xf32>, vector<8x1xf32> -> vector<8x1xf32>
    %cst_17 = arith.constant 3.906250e-03 : f32
    %15 = vector.broadcast %cst_17 : f32 to vector<8x1xf32>
    %16 = arith.mulf %13, %15 : vector<8x1xf32>
    %cst_18 = arith.constant 3.906250e-03 : f32
    %17 = vector.broadcast %cst_18 : f32 to vector<8x1xf32>
    %18 = arith.mulf %14, %17 : vector<8x1xf32>
    %19 = arith.mulf %16, %16 : vector<8x1xf32>
    %20 = arith.subf %18, %19 : vector<8x1xf32>
    %cst_19 = arith.constant 0.000000e+00 : f32
    %21 = vector.broadcast %cst_19 : f32 to vector<8x1xf32>
    %22 = arith.maximumf %20, %21 : vector<8x1xf32>
    %cst_20 = arith.constant 9.99999974E-6 : f32
    %23 = vector.broadcast %cst_20 : f32 to vector<8x1xf32>
    %24 = arith.addf %22, %23 : vector<8x1xf32>
    %25 = math.rsqrt %24 : vector<8x1xf32>
    %cst_21 = arith.constant dense<0.000000e+00> : vector<32x1xf32>
    %26 = tpu.matmul %5, %16, %cst_21 {dimension_numbers = #tpu.dot_dimension_numbers<[1], [0], [0], [1], [0, 0, 1, 1], [], []>} : vector<32x8xf32>, vector<8x1xf32>, vector<32x1xf32> -> vector<32x1xf32>
    %cst_22 = arith.constant dense<0.000000e+00> : vector<32x1xf32>
    %27 = tpu.matmul %5, %25, %cst_22 {dimension_numbers = #tpu.dot_dimension_numbers<[1], [0], [0], [1], [0, 0, 1, 1], [], []>} : vector<32x8xf32>, vector<8x1xf32>, vector<32x1xf32> -> vector<32x1xf32>
    %28 = vector.broadcast %26 : vector<32x1xf32> to vector<32x64xf32>
    %29 = arith.subf %7, %28 : vector<32x64xf32>
    %30 = vector.broadcast %27 : vector<32x1xf32> to vector<32x64xf32>
    %31 = arith.mulf %29, %30 : vector<32x64xf32>
    %32 = arith.truncf %31 : vector<32x64xf32> to vector<32x64xbf16>
    %cst_23 = arith.constant dense<0.000000e+00> : vector<96x64xf32>
    %33 = tpu.matmul %0, %32, %cst_23 {dimension_numbers = #tpu.dot_dimension_numbers<[1], [0], [0], [1], [0, 0, 1, 1], [], []>} : vector<96x32xbf16>, vector<32x64xbf16>, vector<96x64xf32> -> vector<96x64xf32>
    %34 = vector.broadcast %1 : vector<96x1xf32> to vector<96x64xf32>
    %35 = arith.addf %33, %34 : vector<96x64xf32>
    %36 = arith.truncf %35 : vector<96x64xf32> to vector<96x64xbf16>
    %37 = vector.extract_strided_slice %36 {offsets = [32, 0], sizes = [8, 64], strides = [1, 1]} : vector<96x64xbf16> to vector<8x64xbf16>
    %38 = vector.extract_strided_slice %36 {offsets = [64, 0], sizes = [8, 64], strides = [1, 1]} : vector<96x64xbf16> to vector<8x64xbf16>
    %39 = vector.extract_strided_slice %36 {offsets = [0, 0], sizes = [8, 64], strides = [1, 1]} : vector<96x64xbf16> to vector<8x64xbf16>
    %cst_24 = arith.constant dense<0.000000e+00> : vector<64x64xf32>
    %40 = tpu.matmul %37, %39, %cst_24 {dimension_numbers = #tpu.dot_dimension_numbers<[0], [0], [1], [1], [0, 1, 1, 1], [], []>} : vector<8x64xbf16>, vector<8x64xbf16>, vector<64x64xf32> -> vector<64x64xf32>
    %cst_25 = arith.constant dense<0xFF800000> : vector<64xf32>
    %41 = vector.multi_reduction <maximumf>, %40, %cst_25 [0] : vector<64x64xf32> to vector<64xf32>
    %42 = vector.shape_cast %41 : vector<64xf32> to vector<1x64xf32>
    %43 = vector.broadcast %42 : vector<1x64xf32> to vector<64x64xf32>
    %44 = arith.subf %40, %43 : vector<64x64xf32>
    %45 = math.exp %44 : vector<64x64xf32>
    %cst_26 = arith.constant dense<0.000000e+00> : vector<64xf32>
    %46 = vector.multi_reduction <add>, %45, %cst_26 [0] : vector<64x64xf32> to vector<64xf32>
    %47 = vector.shape_cast %46 : vector<64xf32> to vector<1x64xf32>
    %48 = arith.truncf %45 : vector<64x64xf32> to vector<64x64xbf16>
    %cst_27 = arith.constant dense<0.000000e+00> : vector<8x64xf32>
    %49 = tpu.matmul %38, %48, %cst_27 {dimension_numbers = #tpu.dot_dimension_numbers<[1], [0], [0], [1], [0, 0, 1, 1], [], []>} : vector<8x64xbf16>, vector<64x64xbf16>, vector<8x64xf32> -> vector<8x64xf32>
    %50 = tpu.reciprocal %47 {approx = true} : vector<1x64xf32> -> vector<1x64xf32>
    %51 = vector.broadcast %50 : vector<1x64xf32> to vector<8x64xf32>
    %52 = arith.mulf %49, %51 : vector<8x64xf32>
    %c0_28 = arith.constant 0 : index
    %c0_29 = arith.constant 0 : index
    %53 = vector.load %arg9[%c0_28, %c0_29] : memref<32x64xf32, #tpu.memory_space<vmem>>, vector<8x64xf32>
    tpu.vector_store %arg9[%c0_28, %c0_29], %52 {strides = array<i32>} : memref<32x64xf32, #tpu.memory_space<vmem>>, vector<8x64xf32>,
    %54 = vector.extract_strided_slice %36 {offsets = [40, 0], sizes = [8, 64], strides = [1, 1]} : vector<96x64xbf16> to vector<8x64xbf16>
    %55 = vector.extract_strided_slice %36 {offsets = [72, 0], sizes = [8, 64], strides = [1, 1]} : vector<96x64xbf16> to vector<8x64xbf16>
    %56 = vector.extract_strided_slice %36 {offsets = [8, 0], sizes = [8, 64], strides = [1, 1]} : vector<96x64xbf16> to vector<8x64xbf16>
    %cst_30 = arith.constant dense<0.000000e+00> : vector<64x64xf32>
    %57 = tpu.matmul %54, %56, %cst_30 {dimension_numbers = #tpu.dot_dimension_numbers<[0], [0], [1], [1], [0, 1, 1, 1], [], []>} : vector<8x64xbf16>, vector<8x64xbf16>, vector<64x64xf32> -> vector<64x64xf32>
    %cst_31 = arith.constant dense<0xFF800000> : vector<64xf32>
    %58 = vector.multi_reduction <maximumf>, %57, %cst_31 [0] : vector<64x64xf32> to vector<64xf32>
    %59 = vector.shape_cast %58 : vector<64xf32> to vector<1x64xf32>
    %60 = vector.broadcast %59 : vector<1x64xf32> to vector<64x64xf32>
    %61 = arith.subf %57, %60 : vector<64x64xf32>
    %62 = math.exp %61 : vector<64x64xf32>
    %cst_32 = arith.constant dense<0.000000e+00> : vector<64xf32>
    %63 = vector.multi_reduction <add>, %62, %cst_32 [0] : vector<64x64xf32> to vector<64xf32>
    %64 = vector.shape_cast %63 : vector<64xf32> to vector<1x64xf32>
    %65 = arith.truncf %62 : vector<64x64xf32> to vector<64x64xbf16>
    %cst_33 = arith.constant dense<0.000000e+00> : vector<8x64xf32>
    %66 = tpu.matmul %55, %65, %cst_33 {dimension_numbers = #tpu.dot_dimension_numbers<[1], [0], [0], [1], [0, 0, 1, 1], [], []>} : vector<8x64xbf16>, vector<64x64xbf16>, vector<8x64xf32> -> vector<8x64xf32>
    %67 = tpu.reciprocal %64 {approx = true} : vector<1x64xf32> -> vector<1x64xf32>
    %68 = vector.broadcast %67 : vector<1x64xf32> to vector<8x64xf32>
    %69 = arith.mulf %66, %68 : vector<8x64xf32>
    %c8 = arith.constant 8 : index
    %c0_34 = arith.constant 0 : index
    %70 = vector.load %arg9[%c8, %c0_34] : memref<32x64xf32, #tpu.memory_space<vmem>>, vector<8x64xf32>
    tpu.vector_store %arg9[%c8, %c0_34], %69 {strides = array<i32>} : memref<32x64xf32, #tpu.memory_space<vmem>>, vector<8x64xf32>,
    %71 = vector.extract_strided_slice %36 {offsets = [48, 0], sizes = [8, 64], strides = [1, 1]} : vector<96x64xbf16> to vector<8x64xbf16>
    %72 = vector.extract_strided_slice %36 {offsets = [80, 0], sizes = [8, 64], strides = [1, 1]} : vector<96x64xbf16> to vector<8x64xbf16>
    %73 = vector.extract_strided_slice %36 {offsets = [16, 0], sizes = [8, 64], strides = [1, 1]} : vector<96x64xbf16> to vector<8x64xbf16>
    %cst_35 = arith.constant dense<0.000000e+00> : vector<64x64xf32>
    %74 = tpu.matmul %71, %73, %cst_35 {dimension_numbers = #tpu.dot_dimension_numbers<[0], [0], [1], [1], [0, 1, 1, 1], [], []>} : vector<8x64xbf16>, vector<8x64xbf16>, vector<64x64xf32> -> vector<64x64xf32>
    %cst_36 = arith.constant dense<0xFF800000> : vector<64xf32>
    %75 = vector.multi_reduction <maximumf>, %74, %cst_36 [0] : vector<64x64xf32> to vector<64xf32>
    %76 = vector.shape_cast %75 : vector<64xf32> to vector<1x64xf32>
    %77 = vector.broadcast %76 : vector<1x64xf32> to vector<64x64xf32>
    %78 = arith.subf %74, %77 : vector<64x64xf32>
    %79 = math.exp %78 : vector<64x64xf32>
    %cst_37 = arith.constant dense<0.000000e+00> : vector<64xf32>
    %80 = vector.multi_reduction <add>, %79, %cst_37 [0] : vector<64x64xf32> to vector<64xf32>
    %81 = vector.shape_cast %80 : vector<64xf32> to vector<1x64xf32>
    %82 = arith.truncf %79 : vector<64x64xf32> to vector<64x64xbf16>
    %cst_38 = arith.constant dense<0.000000e+00> : vector<8x64xf32>
    %83 = tpu.matmul %72, %82, %cst_38 {dimension_numbers = #tpu.dot_dimension_numbers<[1], [0], [0], [1], [0, 0, 1, 1], [], []>} : vector<8x64xbf16>, vector<64x64xbf16>, vector<8x64xf32> -> vector<8x64xf32>
    %84 = tpu.reciprocal %81 {approx = true} : vector<1x64xf32> -> vector<1x64xf32>
    %85 = vector.broadcast %84 : vector<1x64xf32> to vector<8x64xf32>
    %86 = arith.mulf %83, %85 : vector<8x64xf32>
    %c16 = arith.constant 16 : index
    %c0_39 = arith.constant 0 : index
    %87 = vector.load %arg9[%c16, %c0_39] : memref<32x64xf32, #tpu.memory_space<vmem>>, vector<8x64xf32>
    tpu.vector_store %arg9[%c16, %c0_39], %86 {strides = array<i32>} : memref<32x64xf32, #tpu.memory_space<vmem>>, vector<8x64xf32>,
    %88 = vector.extract_strided_slice %36 {offsets = [56, 0], sizes = [8, 64], strides = [1, 1]} : vector<96x64xbf16> to vector<8x64xbf16>
    %89 = vector.extract_strided_slice %36 {offsets = [88, 0], sizes = [8, 64], strides = [1, 1]} : vector<96x64xbf16> to vector<8x64xbf16>
    %90 = vector.extract_strided_slice %36 {offsets = [24, 0], sizes = [8, 64], strides = [1, 1]} : vector<96x64xbf16> to vector<8x64xbf16>
    %cst_40 = arith.constant dense<0.000000e+00> : vector<64x64xf32>
    %91 = tpu.matmul %88, %90, %cst_40 {dimension_numbers = #tpu.dot_dimension_numbers<[0], [0], [1], [1], [0, 1, 1, 1], [], []>} : vector<8x64xbf16>, vector<8x64xbf16>, vector<64x64xf32> -> vector<64x64xf32>
    %cst_41 = arith.constant dense<0xFF800000> : vector<64xf32>
    %92 = vector.multi_reduction <maximumf>, %91, %cst_41 [0] : vector<64x64xf32> to vector<64xf32>
    %93 = vector.shape_cast %92 : vector<64xf32> to vector<1x64xf32>
    %94 = vector.broadcast %93 : vector<1x64xf32> to vector<64x64xf32>
    %95 = arith.subf %91, %94 : vector<64x64xf32>
    %96 = math.exp %95 : vector<64x64xf32>
    %cst_42 = arith.constant dense<0.000000e+00> : vector<64xf32>
    %97 = vector.multi_reduction <add>, %96, %cst_42 [0] : vector<64x64xf32> to vector<64xf32>
    %98 = vector.shape_cast %97 : vector<64xf32> to vector<1x64xf32>
    %99 = arith.truncf %96 : vector<64x64xf32> to vector<64x64xbf16>
    %cst_43 = arith.constant dense<0.000000e+00> : vector<8x64xf32>
    %100 = tpu.matmul %89, %99, %cst_43 {dimension_numbers = #tpu.dot_dimension_numbers<[1], [0], [0], [1], [0, 0, 1, 1], [], []>} : vector<8x64xbf16>, vector<64x64xbf16>, vector<8x64xf32> -> vector<8x64xf32>
    %101 = tpu.reciprocal %98 {approx = true} : vector<1x64xf32> -> vector<1x64xf32>
    %102 = vector.broadcast %101 : vector<1x64xf32> to vector<8x64xf32>
    %103 = arith.mulf %100, %102 : vector<8x64xf32>
    %c24 = arith.constant 24 : index
    %c0_44 = arith.constant 0 : index
    %104 = vector.load %arg9[%c24, %c0_44] : memref<32x64xf32, #tpu.memory_space<vmem>>, vector<8x64xf32>
    tpu.vector_store %arg9[%c24, %c0_44], %103 {strides = array<i32>} : memref<32x64xf32, #tpu.memory_space<vmem>>, vector<8x64xf32>,
    %c0_45 = arith.constant 0 : index
    %c0_46 = arith.constant 0 : index
    %105 = vector.load %arg9[%c0_45, %c0_46] : memref<32x64xf32, #tpu.memory_space<vmem>>, vector<32x64xf32>
    %106 = arith.truncf %105 : vector<32x64xf32> to vector<32x64xbf16>
    %cst_47 = arith.constant dense<0.000000e+00> : vector<32x64xf32>
    %107 = tpu.matmul %2, %106, %cst_47 {dimension_numbers = #tpu.dot_dimension_numbers<[1], [0], [0], [1], [0, 0, 1, 1], [], []>} : vector<32x32xbf16>, vector<32x64xbf16>, vector<32x64xf32> -> vector<32x64xf32>
    %108 = vector.broadcast %3 : vector<32x1xf32> to vector<32x64xf32>
    %109 = arith.addf %107, %108 : vector<32x64xf32>
    %110 = arith.addf %109, %7 : vector<32x64xf32>
    %c0_48 = arith.constant 0 : index
    %c0_49 = arith.constant 0 : index
    %c0_50 = arith.constant 0 : index
    %111 = vector.load %arg8[%c0_48, %c0_49, %c0_50] : memref<1x32x64xf32, #tpu.memory_space<vmem>>, vector<1x32x64xf32>
    %112 = vector.shape_cast %111 : vector<1x32x64xf32> to vector<32x64xf32>
    %113 = vector.shape_cast %110 : vector<32x64xf32> to vector<1x32x64xf32>
    tpu.vector_store %arg8[%c0_48, %c0_49, %c0_50], %113 {strides = array<i32>} : memref<1x32x64xf32, #tpu.memory_space<vmem>>, vector<1x32x64xf32>,
    return
  }
  func.func @transform_0(%arg0: i32) -> (i32, i32, i32) {
    %c0_i32 = arith.constant 0 : i32
    %c0_i32_0 = arith.constant 0 : i32
    %c0_i32_1 = arith.constant 0 : i32
    return %arg0, %c0_i32, %c0_i32_0 : i32, i32, i32
  }
  func.func @transform_1(%arg0: i32) -> (i32, i32) {
    %c0_i32 = arith.constant 0 : i32
    %c0_i32_0 = arith.constant 0 : i32
    %c0_i32_1 = arith.constant 0 : i32
    return %c0_i32, %c0_i32_0 : i32, i32
  }
  func.func @transform_2(%arg0: i32) -> (i32, i32) {
    %c0_i32 = arith.constant 0 : i32
    %c0_i32_0 = arith.constant 0 : i32
    %c0_i32_1 = arith.constant 0 : i32
    return %c0_i32, %c0_i32_0 : i32, i32
  }
  func.func @transform_3(%arg0: i32) -> (i32, i32) {
    %c0_i32 = arith.constant 0 : i32
    %c0_i32_0 = arith.constant 0 : i32
    %c0_i32_1 = arith.constant 0 : i32
    return %c0_i32, %c0_i32_0 : i32, i32
  }
  func.func @transform_4(%arg0: i32) -> (i32, i32) {
    %c0_i32 = arith.constant 0 : i32
    %c0_i32_0 = arith.constant 0 : i32
    %c0_i32_1 = arith.constant 0 : i32
    return %c0_i32, %c0_i32_0 : i32, i32
  }
  func.func @transform_5(%arg0: i32) -> (i32, i32) {
    %c0_i32 = arith.constant 0 : i32
    %c0_i32_0 = arith.constant 0 : i32
    %c0_i32_1 = arith.constant 0 : i32
    return %c0_i32, %c0_i32_0 : i32, i32
  }
  func.func @transform_6(%arg0: i32) -> (i32, i32) {
    %c0_i32 = arith.constant 0 : i32
    %c0_i32_0 = arith.constant 0 : i32
    %c0_i32_1 = arith.constant 0 : i32
    return %c0_i32, %c0_i32_0 : i32, i32
  }
  func.func @transform_7(%arg0: i32) -> (i32, i32, i32) {
    %c0_i32 = arith.constant 0 : i32
    %c0_i32_0 = arith.constant 0 : i32
    %c0_i32_1 = arith.constant 0 : i32
    return %arg0, %c0_i32, %c0_i32_0 : i32, i32, i32
  }
}

</mosaic_0001>

<bundles_post_ra>
// kernel: tpu_custom_call.1
= control target key start
LH: loop header
LB: loop body
LE: loop exit
PB: predicated region body
PF: predicated region fallthrough
CT: control target
= control target key end

     0   :  { %12 = vsyncpa [#allocation4], 0  ;;  %s3128_s0 = inlined_call_operand.vmem [shape: f32[2,32,64], index: 0, kind: input, shape index: {}]   ;;  %s3129_s1 = inlined_call_operand.vmem [shape: f32[8,32], index: 1, kind: input, shape index: {}]   ;;  %s3130_s2 = inlined_call_operand.vmem [shape: f32[32,8], index: 2, kind: input, shape index: {}]   ;;  %s3131_s3 = inlined_call_operand.vmem [shape: bf16[96,32], index: 3, kind: input, shape index: {}]   ;;  %s3132_s4 = inlined_call_operand.vmem [shape: f32[96,1], index: 4, kind: input, shape index: {}]   ;;  %s3133_s5 = inlined_call_operand.vmem [shape: bf16[32,32], index: 5, kind: input, shape index: {}]   ;;  %s3134_s6 = inlined_call_operand.vmem [shape: f32[32,1], index: 6, kind: input, shape index: {}]   ;;  %s3135_s7 = inlined_call_operand.hbm [shape: f32[2,32,64], index: 7, kind: output, shape index: {}]  }
   0x1   :  { %14 = vsyncpa [#allocation4 + $0x1], 0  ;;  %s2491_s24 = smov 0   ;;  %s2493_s25 = smov 0  }
   0x2   :  { %s2495_s26 = smov 0   ;;  %s2497_s27 = smov 0  }
   0x3 LB: > { %s2512_s28 = sadd.s32 4294967295, %s2443_s27   ;;  %s1965_s29 = sadd.s32 4294967294, %s2443_s27   ;;  %s2443_s27 = sphi %s2497_s27, %s3141_s27   ;;  %s2439_s26 = sphi %s2495_s26, %s3140_s26   ;;  %s2435_s25 = sphi %s2493_s25, %s3139_s25   ;;  %s2431_s24 = sphi %s2491_s24, %s3138_s24  }
   0x4   : > { %s2516_s30 = sadd.s32 1, %s2443_s27   ;;  %s179_s8 = sadd.s32 1, %s2439_s26 }
   0x5   : > { %s176_s9 = ssub.s32 %s2443_s27, %s2516_s30  ;;  %p189_p0 = scmp.ne.s32.totalorder %s2439_s26, %s2435_s25 }
   0x6   : > { %p177_p1 = scmp.eq.s32.totalorder %s176_s9, 0  ;;  %p190_p2 = scmp.eq.s32.totalorder %s2512_s28, 1 }
   0x7   : > { %p195_p3 = scmp.ne.s32.totalorder %s2435_s25, %s2431_s24  ;;  %p196_p4 = scmp.eq.s32.totalorder %s1965_s29, 1 }
   0x8   : > { %s2527_s10 = scalar_select %p177_p1, %s2439_s26, %s179_s8  }
   0x9   : > { %p2529_p5 = por %p190_p2, %p189_p0  ;;  %p2533_p6 = por %p196_p4, %p195_p3 }
   0xa   : > { %p1968_p7 = scmp.ge.s32.totalorder %s2443_s27, 1  ;;  %p240_p8 = scmp.lt.s32.totalorder %s2443_s27, 3 }
   0xc   : > { %p241_p9 = pnand %p1968_p7, %p240_p8 }
   0xd   : > { %p272_p10 = scmp.lt.s32.totalorder (!%p241_p9), %s2512_s28, 1  ;;  %s269_s29 = sand.u32 (!%p241_p9), 1, %s2435_s25  }
   0xe   : > { %244 = sbr.rel (%p241_p9) target bundleno = 1801 (0x709), region = 48  ;;  %s1969_s8 = sshll.u32 (!%p241_p9), %s269_s29, 5 }
   0xf   : > { %s271_s9 = scalar_lea.vmem (!%p241_p9), [#allocation3], %s1969_s8  ;;  %s2448_s20 = smov (!%p241_p9), [#allocation3]  }
  0x10   : > { %s2387_s21 = sshll.u32 (!%p241_p9), %s2448_s20, 4  ;;  %s2388_s21 = int_to_ptr.vmem [resolvable:$false] %s2387_s21 }
  0x11   : > { %s2389_s22 = scalar_lea.vmem (!%p241_p9), %s2388_s21, 1024 }
  0x13   : > { %v2445_v0 = vmov 0.0   ;;  %s273_s13 = scalar_select %p272_p10, %s2512_s28, 1  ;;  %vm319_vm0 = vcmask 523264   ;;  %vm2446_vm1 = vmmov 0   ;;  %v310_v21 = vld [vmem:[%s3129_s1] sm:$0xff]  ;;  %vm348_vm2 = vcmask 261120  }
  0x14   : > { %2097 = vmatprep.subr.mxu0 %v2445_v0  ;;  %2108 = vmatprep.subr.mxu1 %v2445_v0  ;;  %v311_v26 = vld [vmem:[%s3130_s2] sm:$0xff]  ;;  %vm499_vm3 = vcmask 64512   ;;  %v312_v30 = vld [vmem:[%s3130_s2 + $0x8] sm:$0xff]  ;;  %v313_v31 = vld [vmem:[%s3130_s2 + $0x10] sm:$0xff]  ;;  %v2447_v41 = vmov 0   ;;  %vm955_vm4 = vcmask 1043456  }
  0x15   : > { %s2023_s14 = sshll.u32 %s273_s13, 5  ;;  %2105 = vmatprep.mubr.msk.f32.mxu0 %vm2446_vm1, %v2445_v0  ;;  %2116 = vmatprep.mubr.msk.f32.mxu1 %vm2446_vm1, %v2445_v0  ;;  %v314_v34 = vld [vmem:[%s3130_s2 + $0x18] sm:$0xff]  ;;  %v295_v46 = vld [vmem:[%s3132_s4 + $0x28] sm:$0xff]  ;;  %v294_v54 = vld [vmem:[%s3132_s4 + $0x20] sm:$0xff]  ;;  %s1903_s13 = sshll.u32 %s271_s9, 4  ;;  %s3081_s13 = int_to_ptr.vmem [resolvable:$true] %s1903_s13 }
  0x16   : > { %s2546_s17 = scalar_lea.vmem %s3128_s0, %s2023_s14  ;;  %2296 = vset.pattern.permute.xlu1 %v2447_v41  ;;  %2295 = vset.pattern.permute.xlu0 %v2447_v41  ;;  %v297_v47 = vld [vmem:[%s3132_s4 + $0x38] sm:$0xff]  ;;  %v291_v48 = vld [vmem:[%s3132_s4 + $0x8] sm:$0xff]  ;;  %v2297_v55 = vld [vmem:[%s3131_s3] sm:$0xff]   ;;  %s2024_s14 = sshll.u32 %s2512_s28, 9 }
  0x17   : > { %v2549_v1 = vld [vmem:[%s2546_s17 + $0x18] sm:$0xff]  ;;  %v2552_v2 = vld [vmem:[%s2546_s17 + $0x8] sm:$0xff]  ;;  %v2555_v3 = vld [vmem:[%s2546_s17 + $0x10] sm:$0xff]  ;;  %s3079_s18 = scalar_lea.hbm %s3135_s7, %s2024_s14  ;;  %s3088_s28 = scalar_lea.sflag [#allocation4], %s269_s29 }
  0x18   : > { %v329_v4 = vsel %vm319_vm0, %v2549_v1, 0.0  ;;  %v323_v5 = vsel %vm319_vm0, %v2552_v2, 0.0  ;;  %v335_v6 = vmul.f32 %v2549_v1, %v2549_v1  ;;  %v326_v7 = vsel %vm319_vm0, %v2555_v3, 0.0  ;;  %v2569_v10 = vld [vmem:[%s2546_s17] sm:$0xff]  ;;  %v293_v49 = vld [vmem:[%s3132_s4 + $0x18] sm:$0xff]  ;;  %v296_v56 = vld [vmem:[%s3132_s4 + $0x30] sm:$0xff]  ;;  %p2390_p0 = scmp.lt.s32.totalorder %s3081_s13, %s2388_s21 }
  0x19   : > { %330 = vadd.xlane.f32.xlu0 %v329_v4  ;;  %324 = vadd.xlane.f32.xlu1 %v323_v5  ;;  %v334_v9 = vmul.f32 %v2555_v3, %v2555_v3  ;;  %v320_v12 = vsel %vm319_vm0, %v2569_v10, 0.0  ;;  %v333_v13 = vmul.f32 %v2552_v2, %v2552_v2  ;;  %v332_v14 = vmul.f32 %v2569_v10, %v2569_v10  ;;  %v290_v57 = vld [vmem:[%s3132_s4] sm:$0xff]  ;;  %v292_v58 = vld [vmem:[%s3132_s4 + $0x10] sm:$0xff]  ;;  %s2383_s19 = scalar_lea.vmem %s3081_s13, 512 }
  0x1a   : > { %v345_v8 = vsel %vm319_vm0, %v335_v6, 0.0  ;;  %p2384_p11 = scmp.ne.s32.totalorder %s3081_s13, %s2383_s19  ;;  %p2391_p1 = scmp.lt.s32.totalorder %s2389_s22, %s2383_s19 }
  0x1b   : > { %v342_v11 = vsel %vm319_vm0, %v334_v9, 0.0  ;;  %v339_v15 = vsel %vm319_vm0, %v333_v13, 0.0  ;;  %v336_v16 = vsel %vm319_vm0, %v332_v14, 0.0 }
  0x1c   : > { %p2385_p12 = pnand %p2384_p11, %p2529_p5  ;;  %p2392_p2 = por %p2391_p1, %p2390_p0 }
  0x1d   : > { %327 = vadd.xlane.f32.xlu0 %v326_v7  ;;  %346 = vadd.xlane.f32.xlu1 %v345_v8 }
  0x1e   : > { %p2386_p13 = pneg %p2385_p12 }
  0x20   : > { %p2393_p3 = pnand %p2392_p2, %p2386_p13 }
  0x21   : > { %343 = vadd.xlane.f32.xlu0 %v342_v11  ;;  %321 = vadd.xlane.f32.xlu1 %v320_v12 }
  0x25   : > { %340 = vadd.xlane.f32.xlu0 %v339_v15  ;;  %337 = vadd.xlane.f32.xlu1 %v336_v16 }
  0xa2   : > { %v331_v17 = vpop.xlane.xlu0 %330  ;;  %v325_v18 = vpop.xlane.xlu1 %324 }
  0xa3   : > { %2098 = vmatpush3.msra.mxu0 %v331_v17 }
  0xa4   : > { %2099 = vmatprep.subr.mxu0 %v2445_v0 }
  0xa6   : > { %v328_v19 = vpop.xlane.xlu0 %327  ;;  %v347_v20 = vpop.xlane.xlu1 %346 }
  0xa7   : > { %2100 = vmatpush3.msra.mxu0 %v328_v19  ;;  %2109 = vmatpush3.msra.mxu1 %v347_v20 }
  0xa8   : > { %2101 = vmatprep.subr.mxu0 %v2445_v0  ;;  %2110 = vmatprep.subr.mxu1 %v2445_v0 }
  0xa9   : > { %2102 = vmatpush3.msra.mxu0 %v325_v18  ;;  %v2302_v18 = vld [vmem:[%s3131_s3 + $0x28] sm:$0xff]  }
  0xaa   : > { %v344_v22 = vpop.xlane.xlu0 %343  ;;  %2103 = vmatprep.subr.mxu0 %v2445_v0  ;;  %v322_v23 = vpop.xlane.xlu1 %321 }
  0xab   : > { %2104 = vmatpush3.msra.mxu0 %v322_v23  ;;  %2111 = vmatpush3.msra.mxu1 %v344_v22 }
  0xac   : > { %2106 = vmatmul.mubr.msk.f32.vlgmr.msra.gmra.mxu0 %vm348_vm2, %v310_v21  ;;  %2112 = vmatprep.subr.mxu1 %v2445_v0 }
  0xad   : > { %2121 = vmatprep.mubr.msk.f32.mxu0 %vm499_vm3, %v311_v26 }
  0xae   : > { %v341_v24 = vpop.xlane.xlu0 %340  ;;  %v338_v25 = vpop.xlane.xlu1 %337 }
  0xaf   : > { %2113 = vmatpush3.msra.mxu1 %v341_v24 }
  0xb0   : > { %2114 = vmatprep.subr.mxu1 %v2445_v0 }
  0xb1   : > { %2115 = vmatpush3.msra.mxu1 %v338_v25 }
  0xb2   : > { %2117 = vmatmul.mubr.msk.f32.vlgmr.msra.gmra.mxu1 %vm348_vm2, %v310_v21 }
  0xb3   : > { %2129 = vmatprep.mubr.msk.f32.mxu1 %vm499_vm3, %v311_v26 }
 0x16c   : > { %v418_v27 = vpop.f32.mrf.mxu0 }
 0x16d   : > { %v492_v28 = vmul.f32 0.00390625, %v418_v27 }
 0x16e   : > { %v2107_v29 = vpop.f32.mrf.mxu0 }
 0x16f   : > { %2119 = vmatprep.subr.mxu0 %v492_v28  ;;  %v494_v32 = vmul.f32 %v492_v28, %v492_v28 }
 0x170   : > { %2120 = vmatpush3.msra.mxu0 %v492_v28 }
 0x171   : > { %2122 = vmatmul.mubr.msk.f32.vlgmr.msra.gmra.mxu0 %vm499_vm3, %v312_v30 }
 0x172   : > { %v488_v33 = vpop.f32.mrf.mxu1  ;;  %2124 = vmatprep.mubr.msk.f32.mxu0 %vm499_vm3, %v313_v31 }
 0x173   : > { %v493_v35 = vmul.f32 0.00390625, %v488_v33 }
 0x174   : > { %v2118_v36 = vpop.f32.mrf.mxu1 }
 0x175   : > { %v495_v37 = vsub.f32 %v493_v35, %v494_v32  ;;  %2125 = vmatmul.mubr.msk.f32.gmra.mxu0 %vm499_vm3, %v314_v34 }
 0x176   : > { %2139 = vmatprep.mubr.msk.bf16.mxu0 %vm348_vm2, %v2297_v55  ;;  %v306_v55 = vld [vmem:[%s3134_s6] sm:$0xff] }
 0x177   : > { %v496_v38 = vmax.f32 %v495_v37, 0.0 }
 0x179   : > { %v497_v39 = vadd.f32 1e-05, %v496_v38 }
 0x17b   : > { %2305 = vrsqrt.f32 %v497_v39 }
 0x188   : > { %v2306_v40 = vpop.eup %2305 }
 0x189   : > { %2127 = vmatprep.subr.mxu1 %v2306_v40 }
 0x18a   : > { %2128 = vmatpush3.msra.mxu1 %v2306_v40 }
 0x18b   : > { %2130 = vmatmul.mubr.msk.f32.vlgmr.msra.gmra.mxu1 %vm499_vm3, %v312_v30 }
 0x18c   : > { %2132 = vmatprep.mubr.msk.f32.mxu1 %vm499_vm3, %v313_v31 }
 0x18f   : > { %2133 = vmatmul.mubr.msk.f32.gmra.mxu1 %vm499_vm3, %v314_v34 }
 0x231   : > { %v2123_v42 = vpop.f32.mrf.mxu0 }
 0x233   : > { %v578_v43 = vpop.f32.mrf.mxu0 }
 0x235   : > { %v2126_v44 = vpop.f32.mrf.mxu0 }
 0x236   : > { %699 = vperm.xlu1 %2296, %v2126_v44  }
 0x237   : > { %v588_v45 = vpop.f32.mrf.mxu0 }
 0x238   : > { %694 = vperm.xlu0 %2295, %v588_v45  }
 0x23a   : > { %684 = vperm.xlu1 %2296, %v578_v43  }
 0x23c   : > { %759 = vperm.xlu0 %2295, %v295_v46  }
 0x23e   : > { %689 = vperm.xlu1 %2296, %v2123_v42  }
 0x240   : > { %769 = vperm.xlu0 %2295, %v297_v47  }
 0x244   : > { %739 = vperm.xlu0 %2295, %v291_v48  }
 0x248   : > { %749 = vperm.xlu0 %2295, %v293_v49  }
 0x24b   : > { %v2131_v50 = vpop.f32.mrf.mxu1 }
 0x24d   : > { %v663_v51 = vpop.f32.mrf.mxu1 }
 0x24e   : > { %708 = vperm.xlu1 %2296, %v663_v51  }
 0x24f   : > { %v2134_v52 = vpop.f32.mrf.mxu1 }
 0x251   : > { %v673_v53 = vpop.f32.mrf.mxu1 }
 0x252   : > { %723 = vperm.xlu1 %2296, %v2134_v52   ;;  %v299_v52 = vld [vmem:[%s3132_s4 + $0x48] sm:$0xff] }
 0x256   : > { %718 = vperm.xlu1 %2296, %v673_v53   ;;  %v300_v53 = vld [vmem:[%s3132_s4 + $0x50] sm:$0xff] }
 0x25a   : > { %713 = vperm.xlu1 %2296, %v2131_v50  }
 0x25e   : > { %754 = vperm.xlu1 %2296, %v294_v54   ;;  %v298_v54 = vld [vmem:[%s3132_s4 + $0x40] sm:$0xff] }
 0x262   : > { %764 = vperm.xlu1 %2296, %v296_v56   ;;  %v301_v56 = vld [vmem:[%s3132_s4 + $0x58] sm:$0xff] }
 0x266   : > { %734 = vperm.xlu1 %2296, %v290_v57   ;;  %v308_v57 = vld [vmem:[%s3134_s6 + $0x10] sm:$0xff] }
 0x26a   : > { %744 = vperm.xlu1 %2296, %v292_v58   ;;  %v307_v58 = vld [vmem:[%s3134_s6 + $0x8] sm:$0xff] }
 0x2b1   : > { %v700_v59 = vpop.permute.xlu1 %699 }
 0x2b2   : > { %v705_v5 = vsub.f32 %v2549_v1, %v700_v59  ;;  %v2298_v1 = vld [vmem:[%s3131_s3 + $0x8] sm:$0xff]   ;;  %v309_v59 = vld [vmem:[%s3134_s6 + $0x18] sm:$0xff] }
 0x2b3   : > { %v695_v63 = vpop.permute.xlu0 %694 }
 0x2b4   : > { %v704_v6 = vsub.f32 %v2555_v3, %v695_v63  ;;  %v2299_v3 = vld [vmem:[%s3131_s3 + $0x10] sm:$0xff]  }
 0x2b5   : > { %v685_v60 = vpop.permute.xlu1 %684 }
 0x2b6   : > { %v702_v11 = vsub.f32 %v2569_v10, %v685_v60  ;;  %v2301_v10 = vld [vmem:[%s3131_s3 + $0x20] sm:$0xff]  }
 0x2b7   : > { %v760_v19 = vpop.permute.xlu0 %759 }
 0x2b9   : > { %v690_v61 = vpop.permute.xlu1 %689 }
 0x2ba   : > { %v703_v12 = vsub.f32 %v2552_v2, %v690_v61  ;;  %v2300_v2 = vld [vmem:[%s3131_s3 + $0x18] sm:$0xff]  }
 0x2bb   : > { %v770_v21 = vpop.permute.xlu0 %769 }
 0x2bf   : > { %v740_v24 = vpop.permute.xlu0 %739 }
 0x2c3   : > { %v750_v31 = vpop.permute.xlu0 %749 }
 0x2c9   : > { %v709_v62 = vpop.permute.xlu1 %708 }
 0x2ca   : > { %v726_v15 = vmul.f32 %v709_v62, %v702_v11 }
 0x2cd   : > { %v724_v4 = vpop.permute.xlu1 %723 }
 0x2ce   : > { %v729_v8 = vmul.f32 %v724_v4, %v705_v5 }
 0x2d1   : > { %v719_v7 = vpop.permute.xlu1 %718 }
 0x2d2   : > { %v728_v9 = vmul.f32 %v719_v7, %v704_v6 }
 0x2d4   : > { %v731_v13 = vpack.c.bf16 %v729_v8, %v728_v9 }
 0x2d5   : > { %v714_v14 = vpop.permute.xlu1 %713 }
 0x2d6   : > { %v727_v16 = vmul.f32 %v714_v14, %v703_v12  ;;  %2135 = vmatprep.subr.bf16.mxu0 %v731_v13 }
 0x2d7   : > { %2136 = vmatpush3.bf16.msra.mxu0 %v731_v13 }
 0x2d8   : > { %v730_v17 = vpack.c.bf16 %v727_v16, %v726_v15 }
 0x2d9   : > { %v755_v20 = vpop.permute.xlu1 %754 }
 0x2da   : > { %2137 = vmatprep.subr.bf16.mxu0 %v730_v17 }
 0x2db   : > { %2138 = vmatpush3.bf16.msra.mxu0 %v730_v17 }
 0x2dd   : > { %v765_v22 = vpop.permute.xlu1 %764 }
 0x2de   : > { %2140 = vmatmul.mubr.msk.bf16.vlgmr.msra.gmra.mxu0 %vm348_vm2, %v2298_v1 }
 0x2df   : > { %2143 = vmatprep.mubr.msk.bf16.mxu0 %vm348_vm2, %v2299_v3 }
 0x2e1   : > { %v735_v26 = vpop.permute.xlu1 %734 }
 0x2e5   : > { %v745_v35 = vpop.permute.xlu1 %744 }
 0x2e6   : > { %2144 = vmatmul.mubr.msk.bf16.gmra.mxu0 %vm348_vm2, %v2300_v2 }
 0x2e7   : > { %2147 = vmatprep.mubr.msk.bf16.mxu0 %vm348_vm2, %v2301_v10 }
 0x2ee   : > { %2148 = vmatmul.mubr.msk.bf16.gmra.mxu0 %vm348_vm2, %v2302_v18 }
 0x39e   : > { %v2141_v23 = vpop.f32.mrf.mxu0 }
 0x39f   : > { %v883_v37 = vadd.f32 %v2141_v23, %v745_v35 }
 0x3a0   : > { %v874_v25 = vpop.f32.mrf.mxu0 }
 0x3a1   : > { %v875_v29 = vadd.f32 %v874_v25, %v735_v26 }
 0x3a2   : > { %v2142_v27 = vpop.f32.mrf.mxu0 }
 0x3a3   : > { %v886_v33 = vadd.f32 %v2142_v27, %v750_v31 }
 0x3a4   : > { %v877_v28 = vpop.f32.mrf.mxu0 }
 0x3a5   : > { %v878_v30 = vadd.f32 %v877_v28, %v740_v24  ;;  %v922_v41 = vpack.c.bf16 %v886_v33, %v883_v37 }
 0x3a6   : > { %v2145_v32 = vpop.f32.mrf.mxu0 }
 0x3a7   : > { %v921_v34 = vpack.c.bf16 %v878_v30, %v875_v29  ;;  %v899_v49 = vadd.f32 %v2145_v32, %v765_v22  ;;  %v1591_v4 = vrot.slane %v922_v41, 4  ;;  %v1388_v5 = vsel %vm955_vm4, %v922_v41, 0 }
 0x3a8   : > { %v890_v36 = vpop.f32.mrf.mxu0 }
 0x3a9   : > { %v1160_v38 = vrot.slane %v921_v34, 4  ;;  %2247 = vmatprep.subr.msk.bf16.mxu1 %vm955_vm4, %v921_v34  ;;  %v957_v39 = vsel %vm955_vm4, %v921_v34, 0  ;;  %v891_v44 = vadd.f32 %v890_v36, %v755_v20  ;;  %v1605_v13 = vsel %vm955_vm4, %v1591_v4, 0 }
 0x3aa   : > { %v2146_v40 = vpop.f32.mrf.mxu0  ;;  %2152 = vmatpush3.bf16.msra.mxu1 %v957_v39 }
 0x3ab   : > { %2248 = vmatprep.subr.msk.bf16.mxu0 %vm955_vm4, %v1160_v38  ;;  %v1174_v42 = vsel %vm955_vm4, %v1160_v38, 0  ;;  %2161 = vmatprep.subr.bf16.mxu1 %v2445_v0  ;;  %v902_v48 = vadd.f32 %v2146_v40, %v770_v21 }
 0x3ac   : > { %v893_v43 = vpop.f32.mrf.mxu0  ;;  %2174 = vmatpush3.bf16.msra.mxu0 %v1174_v42 }
 0x3ad   : > { %v894_v45 = vadd.f32 %v893_v43, %v760_v19  ;;  %2249 = vmatprep.subr.msk.bf16.mxu0 %vm955_vm4, %v922_v41  ;;  %v924_v50 = vpack.c.bf16 %v902_v48, %v899_v49 }
 0x3ae   : > { %v2718_v2 = vpop.f32.mrf.mxu0 }
 0x3af   : > { %v923_v46 = vpack.c.bf16 %v894_v45, %v891_v44  ;;  %v1572_v51 = vrot.slane %v924_v50, 4 }
 0x3b0   : > { %v2720_v10 = vpop.f32.mrf.mxu0 }
 0x3b1   : > { %927 = vxpose.xlu1.c.b16.start.end [1/1] (short) (narrow) %v923_v46, 64  ;;  %v1141_v47 = vrot.slane %v923_v46, 4 }
 0x3b2   : > { %v2722_v18 = vpop.f32.mrf.mxu0 }
 0x3b3   : > { %1143 = vxpose.xlu0.c.b16.start.end [1/1] (short) (narrow) %v1141_v47, 64 }
 0x3b4   : > { %v2724_v19 = vpop.f32.mrf.mxu0 }
 0x3be   : > { %1574 = vxpose.xlu1.c.b16.start.end [1/1] (short) (narrow) %v1572_v51, 64 }
 0x3c0   : > { %1359 = vxpose.xlu0.c.b16.start.end [1/1] (short) (narrow) %v924_v50, 64 }
 0x3ce   : > { %779 = vperm.xlu1 %2296, %v299_v52  }
 0x3d2   : > { %784 = vperm.xlu1 %2296, %v300_v53  }
 0x3d5   : > { %774 = vperm.xlu0 %2295, %v298_v54  }
 0x3d6   : > { %1798 = vperm.xlu1 %2296, %v306_v55  }
 0x3d9   : > { %789 = vperm.xlu0 %2295, %v301_v56  }
 0x3da   : > { %1808 = vperm.xlu1 %2296, %v308_v57  }
 0x3dd   : > { %1803 = vperm.xlu0 %2295, %v307_v58  }
 0x3e1   : > { %1813 = vperm.xlu0 %2295, %v309_v59  }
 0x413   : > { %v935_v60 = vpop.trf.xlu1 }
 0x414   : > { %2153 = vmatprep.mubr.msk.bf16.mxu1 %vm499_vm3, %v935_v60 }
 0x415   : > { %v1151_v61 = vpop.trf.xlu0 }
 0x416   : > { %2175 = vmatprep.mubr.msk.bf16.mxu0 %vm499_vm3, %v1151_v61 }
 0x417   : > { %v936_v62 = vpop.trf.xlu1 }
 0x418   : > { %2154 = vmatmul.mubr.msk.bf16.vlgmr.msra.gmra.mxu1 %vm499_vm3, %v936_v62 }
 0x419   : > { %v1152_v63 = vpop.trf.xlu0 }
 0x41a   : > { %2176 = vmatmul.mubr.msk.bf16.vlgmr.msra.gmra.mxu0 %vm499_vm3, %v1152_v63 }
 0x41b   : > { %2196 = vmatpush3.bf16.msra.mxu0 %v1388_v5  ;;  %v937_v6 = vpop.trf.xlu1 }
 0x41c   : > { %2250 = vmatprep.subr.msk.bf16.mxu0 %vm955_vm4, %v1591_v4  ;;  %2157 = vmatprep.mubr.msk.bf16.mxu1 %vm499_vm3, %v937_v6 }
 0x41d   : > { %v1153_v7 = vpop.trf.xlu0 }
 0x41e   : > { %2179 = vmatprep.mubr.msk.bf16.mxu0 %vm499_vm3, %v1153_v7 }
 0x41f   : > { %v938_v8 = vpop.trf.xlu1 }
 0x420   : > { %2158 = vmatmul.mubr.msk.bf16.gmra.mxu1 %vm499_vm3, %v938_v8 }
 0x421   : > { %v1154_v9 = vpop.trf.xlu0  ;;  %2169 = vmatprep.mubr.msk.bf16.mxu1 %vm2446_vm1, %v2445_v0 }
 0x422   : > { %2180 = vmatmul.mubr.msk.bf16.gmra.mxu0 %vm499_vm3, %v1154_v9 }
 0x423   : > { %v1582_v15 = vpop.trf.xlu1 }
 0x425   : > { %v1367_v11 = vpop.trf.xlu0 }
 0x426   : > { %2197 = vmatprep.mubr.msk.bf16.mxu0 %vm499_vm3, %v1367_v11 }
 0x427   : > { %v1583_v17 = vpop.trf.xlu1 }
 0x429   : > { %v1368_v12 = vpop.trf.xlu0 }
 0x42a   : > { %2198 = vmatmul.mubr.msk.bf16.vlgmr.msra.gmra.mxu0 %vm499_vm3, %v1368_v12 }
 0x42b   : > { %2218 = vmatpush3.bf16.msra.mxu0 %v1605_v13  ;;  %v1584_v1 = vpop.trf.xlu1 }
 0x42d   : > { %v1369_v14 = vpop.trf.xlu0 }
 0x42e   : > { %2201 = vmatprep.mubr.msk.bf16.mxu0 %vm499_vm3, %v1369_v14 }
 0x42f   : > { %v1585_v3 = vpop.trf.xlu1 }
 0x431   : > { %v1370_v16 = vpop.trf.xlu0 }
 0x432   : > { %2202 = vmatmul.mubr.msk.bf16.gmra.mxu0 %vm499_vm3, %v1370_v16 }
 0x433   : > { %2219 = vmatprep.mubr.msk.bf16.mxu0 %vm499_vm3, %v1582_v15 }
 0x43a   : > { %2220 = vmatmul.mubr.msk.bf16.vlgmr.msra.gmra.mxu0 %vm499_vm3, %v1583_v17 }
 0x43b   : > { %2223 = vmatprep.mubr.msk.bf16.mxu0 %vm499_vm3, %v1584_v1 }
 0x442   : > { %2224 = vmatmul.mubr.msk.bf16.gmra.mxu0 %vm499_vm3, %v1585_v3 }
 0x4d8   : > { %v2726_v20 = vpop.f32.mrf.mxu1 }
 0x4d9   : > { %v1026_v33 = vsel %vm319_vm0, %v2726_v20, -inf }
 0x4da   : > { %v2728_v21 = vpop.f32.mrf.mxu1  ;;  %v2730_v22 = vpop.f32.mrf.mxu0 }
 0x4db   : > { %v1243_v31 = vsel %vm319_vm0, %v2730_v22, -inf  ;;  %v1024_v43 = vsel %vm319_vm0, %v2728_v21, -inf }
 0x4dc   : > { %v2732_v23 = vpop.f32.mrf.mxu1  ;;  %v2734_v24 = vpop.f32.mrf.mxu0 }
 0x4dd   : > { %v1027_v34 = vsel %vm319_vm0, %v2732_v23, -inf  ;;  %v1241_v35 = vsel %vm319_vm0, %v2734_v24, -inf }
 0x4de   : > { %v2736_v25 = vpop.f32.mrf.mxu1  ;;  %v2738_v26 = vpop.f32.mrf.mxu0 }
 0x4df   : > { %v1244_v39 = vsel %vm319_vm0, %v2738_v26, -inf  ;;  %v1025_v44 = vsel %vm319_vm0, %v2736_v25, -inf }
 0x4e0   : > { %v2740_v27 = vpop.f32.mrf.mxu1  ;;  %v2742_v28 = vpop.f32.mrf.mxu0 }
 0x4e1   : > { %v1032_v36 = vsel %vm319_vm0, %v2740_v27, -inf  ;;  %v1242_v50 = vsel %vm319_vm0, %v2742_v28, -inf }
 0x4e2   : > { %v2744_v29 = vpop.f32.mrf.mxu1  ;;  %v2746_v30 = vpop.f32.mrf.mxu0  ;;  %v1033_v49 = vmax.f32 %v1026_v33, %v1032_v36 }
 0x4e3   : > { %v1249_v32 = vsel %vm319_vm0, %v2746_v30, -inf  ;;  %v1028_v40 = vsel %vm319_vm0, %v2744_v29, -inf }
 0x4e4   : > { %v2760_v37 = vpop.f32.mrf.mxu1  ;;  %v2762_v38 = vpop.f32.mrf.mxu0  ;;  %v1250_v45 = vmax.f32 %v1243_v31, %v1249_v32  ;;  %v1029_v53 = vmax.f32 %v1024_v43, %v1028_v40 }
 0x4e5   : > { %v1034_v41 = vsel %vm319_vm0, %v2760_v37, -inf  ;;  %v1245_v42 = vsel %vm319_vm0, %v2762_v38, -inf }
 0x4e6   : > { %v1035_v46 = vmax.f32 %v1027_v34, %v1034_v41  ;;  %v2776_v47 = vpop.f32.mrf.mxu1  ;;  %v2778_v48 = vpop.f32.mrf.mxu0  ;;  %v1246_v54 = vmax.f32 %v1241_v35, %v1245_v42 }
 0x4e7   : > { %v1030_v51 = vsel %vm319_vm0, %v2776_v47, -inf  ;;  %v1251_v52 = vsel %vm319_vm0, %v2778_v48, -inf }
 0x4e8   : > { %v1031_v55 = vmax.f32 %v1025_v44, %v1030_v51  ;;  %v1252_v56 = vmax.f32 %v1244_v39, %v1251_v52  ;;  %v2786_v57 = vpop.f32.mrf.mxu0  ;;  %v1037_v59 = vmax.f32 %v1033_v49, %v1035_v46 }
 0x4e9   : > { %v1247_v58 = vsel %vm319_vm0, %v2786_v57, -inf }
 0x4ea   : > { %v1036_v60 = vmax.f32 %v1029_v53, %v1031_v55  ;;  %v1254_v61 = vmax.f32 %v1250_v45, %v1252_v56  ;;  %v1248_v62 = vmax.f32 %v1242_v50, %v1247_v58  ;;  %v2790_v63 = vpop.f32.mrf.mxu0 }
 0x4eb   : > { %v1457_v33 = vsel %vm319_vm0, %v2790_v63, -inf }
 0x4ec   : > { %v1038_v4 = vmax.f32 %v1036_v60, %v1037_v59  ;;  %v1253_v5 = vmax.f32 %v1246_v54, %v1248_v62  ;;  %v2792_v6 = vpop.f32.mrf.mxu0 }
 0x4ed   : > { %v1455_v43 = vsel %vm319_vm0, %v2792_v6, -inf }
 0x4ee   : > { %v1039_v7 = vrot.slane %v1038_v4, 4  ;;  %v1255_v8 = vmax.f32 %v1253_v5, %v1254_v61  ;;  %v2794_v9 = vpop.f32.mrf.mxu0 }
 0x4ef   : > { %v1458_v40 = vsel %vm319_vm0, %v2794_v9, -inf }
 0x4f0   : > { %v1040_v11 = vmax.f32 %v1038_v4, %v1039_v7  ;;  %v1256_v12 = vrot.slane %v1255_v8, 4  ;;  %v2796_v13 = vpop.f32.mrf.mxu0 }
 0x4f1   : > { %v1456_v44 = vsel %vm319_vm0, %v2796_v13, -inf }
 0x4f2   : > { %v1041_v14 = vrot.slane %v1040_v11, 2  ;;  %v1257_v15 = vmax.f32 %v1255_v8, %v1256_v12  ;;  %v2798_v16 = vpop.f32.mrf.mxu0 }
 0x4f3   : > { %v1463_v34 = vsel %vm319_vm0, %v2798_v16, -inf }
 0x4f4   : > { %v1042_v17 = vmax.f32 %v1040_v11, %v1041_v14  ;;  %v1258_v1 = vrot.slane %v1257_v15, 2  ;;  %v2800_v3 = vpop.f32.mrf.mxu0  ;;  %v1464_v45 = vmax.f32 %v1457_v33, %v1463_v34 }
 0x4f5   : > { %v1459_v46 = vsel %vm319_vm0, %v2800_v3, -inf }
 0x4f6   : > { %v1043_v31 = vrot.slane %v1042_v17, 1  ;;  %v1259_v32 = vmax.f32 %v1257_v15, %v1258_v1  ;;  %v2806_v35 = vpop.f32.mrf.mxu0  ;;  %v1460_v12 = vmax.f32 %v1455_v43, %v1459_v46 }
 0x4f7   : > { %v1465_v41 = vsel %vm319_vm0, %v2806_v35, -inf }
 0x4f8   : > { %v2808_v36 = vmax.f32 %v1042_v17, %v1043_v31  ;;  %v1260_v39 = vrot.slane %v1259_v32, 1  ;;  %v2814_v42 = vpop.f32.mrf.mxu0 }
 0x4fa   : > { %v1045_v49 = vsub.f32 %v2728_v21, %v2808_v36  ;;  %v1046_v50 = vsub.f32 %v2736_v25, %v2808_v36  ;;  %v1047_v51 = vsub.f32 %v2726_v20, %v2808_v36  ;;  %v1048_v52 = vsub.f32 %v2732_v23, %v2808_v36  ;;  %v2830_v53 = vpop.f32.mrf.mxu0 }
 0x4fb   : > { %v1049_v54 = vsub.f32 %v2744_v29, %v2808_v36  ;;  %v1050_v55 = vsub.f32 %v2776_v47, %v2808_v36  ;;  %v2836_v56 = vmax.f32 %v1259_v32, %v1260_v39  ;;  %v1466_v21 = vmax.f32 %v1458_v40, %v1465_v41 }
 0x4fc   : > { %v1051_v25 = vsub.f32 %v2740_v27, %v2808_v36  ;;  %v1053_v58 = vmul.f32 1.442695, %v1045_v49  ;;  %v1055_v59 = vmul.f32 1.442695, %v1046_v50  ;;  %v1057_v20 = vmul.f32 1.442695, %v1047_v51  ;;  %v2840_v60 = vpop.f32.mrf.mxu0 }
 0x4fd   : > { %v1059_v23 = vmul.f32 1.442695, %v1048_v52  ;;  %v1061_v61 = vmul.f32 1.442695, %v1049_v54  ;;  %v1262_v62 = vsub.f32 %v2734_v24, %v2836_v56  ;;  %v1461_v29 = vsel %vm319_vm0, %v2814_v42, -inf }
 0x4fe   : > { %2307 = vpow2.f32 %v1053_v58  ;;  %v1063_v47 = vmul.f32 1.442695, %v1050_v55  ;;  %v1263_v4 = vsub.f32 %v2742_v28, %v2836_v56  ;;  %v1264_v27 = vsub.f32 %v2730_v22, %v2836_v56  ;;  %v2850_v5 = vpop.f32.mrf.mxu0 }
 0x4ff   : > { %2309 = vpow2.f32 %v1055_v59  ;;  %v1265_v7 = vsub.f32 %v2738_v26, %v2836_v56  ;;  %v1266_v24 = vsub.f32 %v2762_v38, %v2836_v56  ;;  %v1267_v8 = vsub.f32 %v2786_v57, %v2836_v56 }
 0x500   : > { %2311 = vpow2.f32 %v1057_v20  ;;  %v1065_v11 = vmul.f32 1.442695, %v1051_v25  ;;  %v1468_v14 = vmax.f32 %v1464_v45, %v1466_v21  ;;  %v2858_v28 = vpop.f32.mrf.mxu0  ;;  %v1268_v22 = vsub.f32 %v2746_v30, %v2836_v56 }
 0x501   : > { %2313 = vpow2.f32 %v1059_v23  ;;  %v1270_v15 = vmul.f32 1.442695, %v1262_v62  ;;  %v1272_v17 = vmul.f32 1.442695, %v1263_v4  ;;  %v1274_v26 = vmul.f32 1.442695, %v1264_v27 }
 0x502   : > { %2315 = vpow2.f32 %v1061_v61  ;;  %v1276_v1 = vmul.f32 1.442695, %v1265_v7  ;;  %v1462_v31 = vmax.f32 %v1456_v44, %v1461_v29  ;;  %v2862_v38 = vpop.f32.mrf.mxu0  ;;  %v1278_v57 = vmul.f32 1.442695, %v1266_v24 }
 0x503   : > { %2317 = vpow2.f32 %v1063_v47  ;;  %v1280_v32 = vmul.f32 1.442695, %v1267_v8  ;;  %v1674_v33 = vsel %vm319_vm0, %v2830_v53, -inf  ;;  %v1672_v39 = vsel %vm319_vm0, %v2840_v60, -inf }
 0x504   : > { %2319 = vpow2.f32 %v1065_v11  ;;  %v1467_v34 = vmax.f32 %v1460_v12, %v1462_v31  ;;  %v1680_v30 = vsel %vm319_vm0, %v2862_v38, -inf  ;;  %v2870_v40 = vpop.f32.mrf.mxu0  ;;  %v1675_v41 = vsel %vm319_vm0, %v2850_v5, -inf }
 0x505   : > { %2321 = vpow2.f32 %v1270_v15  ;;  %v1676_v43 = vsel %vm319_vm0, %v2870_v40, -inf  ;;  %v1052_v44 = vsub.f32 %v2760_v37, %v2808_v36  ;;  %v1673_v46 = vsel %vm319_vm0, %v2858_v28, -inf }
 0x506   : > { %2323 = vpow2.f32 %v1272_v17  ;;  %v1469_v45 = vmax.f32 %v1467_v34, %v1468_v14  ;;  %v1681_v49 = vmax.f32 %v1674_v33, %v1680_v30  ;;  %v2880_v50 = vpop.f32.mrf.mxu0  ;;  %v1677_v51 = vmax.f32 %v1672_v39, %v1676_v43 }
 0x507   : > { %2325 = vpow2.f32 %v1274_v26  ;;  %v1682_v52 = vsel %vm319_vm0, %v2880_v50, -inf  ;;  %v1269_v54 = vsub.f32 %v2778_v48, %v2836_v56  ;;  %v1067_v36 = vmul.f32 1.442695, %v1052_v44 }
 0x508   : > { %2327 = vpow2.f32 %v1276_v1  ;;  %v1470_v55 = vrot.slane %v1469_v45, 4  ;;  %v1683_v21 = vmax.f32 %v1675_v41, %v1682_v52  ;;  %v2886_v37 = vpop.f32.mrf.mxu0  ;;  %v1282_v25 = vmul.f32 1.442695, %v1268_v22 }
 0x509   : > { %v1678_v58 = vsel %vm319_vm0, %v2886_v37, -inf  ;;  %2329 = vpow2.f32 %v1278_v57  ;;  %v1284_v62 = vmul.f32 1.442695, %v1269_v54 }
 0x50a   : > { %v1471_v59 = vmax.f32 %v1469_v45, %v1470_v55  ;;  %v1679_v20 = vmax.f32 %v1673_v46, %v1678_v58  ;;  %2331 = vpow2.f32 %v1280_v32  ;;  %v1685_v61 = vmax.f32 %v1681_v49, %v1683_v21 }
 0x50b   : > { %v2890_v23 = vpop.eup %2307  ;;  %2333 = vpow2.f32 %v1067_v36 }
 0x50c   : > { %v2892_v29 = vpop.eup %2309  ;;  %v1069_v48 = vsel %vm319_vm0, %v2890_v23, 0.0  ;;  %v1472_v56 = vrot.slane %v1471_v59, 2  ;;  %v1684_v47 = vmax.f32 %v1677_v51, %v1679_v20  ;;  %2335 = vpow2.f32 %v1282_v25 }
 0x50d   : > { %v2896_v4 = vpop.eup %2311  ;;  %v1070_v27 = vsel %vm319_vm0, %v2892_v29, 0.0  ;;  %2337 = vpow2.f32 %v1284_v62 }
 0x50e   : > { %v2900_v7 = vpop.eup %2313  ;;  %v1071_v24 = vadd.f32 %v1070_v27, %v1069_v48  ;;  %v1473_v8 = vmax.f32 %v1471_v59, %v1472_v56  ;;  %v1072_v12 = vsel %vm319_vm0, %v2896_v4, 0.0  ;;  %v1686_v14 = vmax.f32 %v1684_v47, %v1685_v61 }
 0x50f   : > { %v2902_v11 = vpop.eup %2315  ;;  %v1074_v1 = vsel %vm319_vm0, %v2900_v7, 0.0 }
 0x510   : > { %v2906_v22 = vpop.eup %2317  ;;  %v1073_v15 = vadd.f32 %v1072_v12, %v1071_v24  ;;  %v1474_v17 = vrot.slane %v1473_v8, 1  ;;  %v1076_v34 = vsel %vm319_vm0, %v2902_v11, 0.0  ;;  %v1687_v30 = vrot.slane %v1686_v14, 4 }
 0x511   : > { %v2320_v26 = vpop.eup %2319  ;;  %v1078_v51 = vsel %vm319_vm0, %v2906_v22, 0.0 }
 0x512   : > { %v2910_v31 = vpop.eup %2321  ;;  %v1075_v57 = vadd.f32 %v1074_v1, %v1073_v15  ;;  %v1475_v32 = vmax.f32 %v1473_v8, %v1474_v17  ;;  %v1080_v36 = vsel %vm319_vm0, %v2320_v26, 0.0  ;;  %v1688_v61 = vmax.f32 %v1686_v14, %v1687_v30 }
 0x513   : > { %v2912_v33 = vpop.eup %2323  ;;  %v1286_v39 = vsel %vm319_vm0, %v2910_v31, 0.0 }
 0x514   : > { %v2918_v41 = vpop.eup %2325  ;;  %v1077_v43 = vadd.f32 %v1076_v34, %v1075_v57  ;;  %v1287_v44 = vsel %vm319_vm0, %v2912_v33, 0.0  ;;  %v1476_v45 = vsub.f32 %v2792_v6, %v1475_v32  ;;  %v1477_v46 = vsub.f32 %v2796_v13, %v1475_v32 }
 0x515   : > { %v2924_v49 = vpop.eup %2327  ;;  %v1288_v52 = vadd.f32 %v1287_v44, %v1286_v39  ;;  %v1478_v54 = vsub.f32 %v2790_v63, %v1475_v32  ;;  %v1479_v55 = vsub.f32 %v2794_v9, %v1475_v32  ;;  %v1289_v25 = vsel %vm319_vm0, %v2918_v41, 0.0 }
 0x516   : > { %v1079_v21 = vadd.f32 %v1078_v51, %v1077_v43  ;;  %v1480_v6 = vsub.f32 %v2800_v3, %v1475_v32  ;;  %v2934_v58 = vpop.eup %2329  ;;  %v1291_v59 = vsel %vm319_vm0, %v2924_v49, 0.0  ;;  %v1484_v20 = vmul.f32 1.442695, %v1476_v45 }
 0x517   : > { %v1290_v13 = vadd.f32 %v1289_v25, %v1288_v52  ;;  %v2938_v62 = vpop.eup %2331  ;;  %v1481_v9 = vsub.f32 %v2814_v42, %v1475_v32  ;;  %v1486_v48 = vmul.f32 1.442695, %v1477_v46  ;;  %v1488_v56 = vmul.f32 1.442695, %v1478_v54  ;;  %v775_v25 = vpop.permute.xlu0 %774 }
 0x518   : > { %v1081_v63 = vadd.f32 %v1080_v36, %v1079_v21  ;;  %v2334_v47 = vpop.eup %2333  ;;  %2339 = vpow2.f32 %v1484_v20  ;;  %v1490_v24 = vmul.f32 1.442695, %v1479_v55  ;;  %v1293_v8 = vsel %vm319_vm0, %v2934_v58, 0.0 }
 0x519   : > { %v1292_v27 = vadd.f32 %v1291_v59, %v1290_v13  ;;  %v2941_v3 = vpop.eup %2335  ;;  %v1482_v12 = vsub.f32 %v2798_v16, %v1475_v32  ;;  %2341 = vpow2.f32 %v1486_v48  ;;  %v1492_v14 = vmul.f32 1.442695, %v1480_v6  ;;  %v780_v13 = vpop.permute.xlu1 %779 }
 0x51a   : > { %2343 = vpow2.f32 %v1488_v56  ;;  %v1689_v17 = vrot.slane %v1688_v61, 2  ;;  %v1093_v1 = vpack.c.bf16 %v2334_v47, %v2320_v26  ;;  %v1295_v42 = vsel %vm319_vm0, %v2938_v62, 0.0  ;;  %v2948_v34 = vpop.eup %2337 }
 0x51b   : > { %v1294_v15 = vadd.f32 %v1293_v8, %v1292_v27  ;;  %2345 = vpow2.f32 %v1490_v24  ;;  %v1494_v57 = vmul.f32 1.442695, %v1481_v9  ;;  %v1297_v30 = vsel %vm319_vm0, %v2941_v3, 0.0 }
 0x51c   : > { %v1690_v43 = vmax.f32 %v1688_v61, %v1689_v17  ;;  %2162 = vmatpush3.bf16.msra.mxu1 %v1093_v1  ;;  %2347 = vpow2.f32 %v1492_v14  ;;  %v1496_v16 = vmul.f32 1.442695, %v1482_v12  ;;  %v1483_v44 = vsub.f32 %v2806_v35, %v1475_v32 }
 0x51d   : > { %v1296_v39 = vadd.f32 %v1295_v42, %v1294_v15  ;;  %2163 = vmatprep.subr.bf16.mxu1 %v2445_v0  ;;  %v1082_v26 = vsel %vm319_vm0, %v2334_v47, 0.0  ;;  %v1092_v51 = vpack.c.bf16 %v2906_v22, %v2902_v11  ;;  %2349 = vpow2.f32 %v1494_v57 }
 0x51e   : > { %v1691_v46 = vrot.slane %v1690_v43, 1  ;;  %v2957_v52 = vadd.f32 %v1082_v26, %v1081_v63  ;;  %v1498_v54 = vmul.f32 1.442695, %v1483_v44  ;;  %v1299_v55 = vsel %vm319_vm0, %v2948_v34, 0.0 }
 0x51f   : > { %v1298_v45 = vadd.f32 %v1297_v30, %v1296_v39  ;;  %2351 = vpow2.f32 %v1496_v16  ;;  %v1091_v35 = vpack.c.bf16 %v2900_v7, %v2896_v4  ;;  %v907_v20 = vadd.f32 %v2720_v10, %v775_v25 }
 0x520   : > { %v1692_v21 = vmax.f32 %v1690_v43, %v1691_v46  ;;  %2164 = vmatpush3.bf16.msra.mxu1 %v1092_v51  ;;  %2353 = vpow2.f32 %v1498_v54  ;;  %v1090_v10 = vpack.c.bf16 %v2892_v29, %v2890_v23  ;;  %v1310_v12 = vpack.c.bf16 %v2948_v34, %v2941_v3 }
 0x521   : > { %v2961_v36 = vadd.f32 %v1299_v55, %v1298_v45  ;;  %2165 = vmatprep.subr.bf16.mxu1 %v2445_v0  ;;  %v1309_v34 = vpack.c.bf16 %v2938_v62, %v2934_v58  ;;  %v1308_v26 = vpack.c.bf16 %v2924_v49, %v2918_v41 }
 0x522   : > { %v1693_v11 = vsub.f32 %v2840_v60, %v1692_v21  ;;  %v1694_v22 = vsub.f32 %v2858_v28, %v1692_v21  ;;  %v1695_v32 = vsub.f32 %v2830_v53, %v1692_v21  ;;  %v1696_v6 = vsub.f32 %v2850_v5, %v1692_v21 }
 0x523   : > { %v1697_v59 = vsub.f32 %v2870_v40, %v1692_v21  ;;  %v1698_v60 = vsub.f32 %v2886_v37, %v1692_v21  ;;  %v910_v5 = vadd.f32 %v2724_v19, %v780_v13  ;;  %v1699_v37 = vsub.f32 %v2862_v38, %v1692_v21 }
 0x524   : > { %v1701_v61 = vmul.f32 1.442695, %v1693_v11  ;;  %v1703_v63 = vmul.f32 1.442695, %v1694_v22  ;;  %v1705_v9 = vmul.f32 1.442695, %v1695_v32  ;;  %2166 = vmatpush3.bf16.msra.mxu1 %v1091_v35  ;;  %v1700_v29 = vsub.f32 %v2880_v50, %v1692_v21 }
 0x525   : > { %v2972_v48 = vpop.eup %2339  ;;  %v1707_v4 = vmul.f32 1.442695, %v1696_v6  ;;  %2167 = vmatprep.subr.bf16.mxu1 %v2445_v0  ;;  %v1709_v56 = vmul.f32 1.442695, %v1697_v59  ;;  %v925_v27 = vpack.c.bf16 %v910_v5, %v907_v20  ;;  %v1711_v23 = vmul.f32 1.442695, %v1698_v60 }
 0x526   : > { %v2976_v53 = vpop.eup %2341  ;;  %v1500_v28 = vsel %vm319_vm0, %v2972_v48, 0.0  ;;  %2355 = vpow2.f32 %v1701_v61  ;;  %v1713_v15 = vmul.f32 1.442695, %v1699_v37  ;;  %v1715_v3 = vmul.f32 1.442695, %v1700_v29 }
 0x527   : > { %v2983_v40 = vpop.eup %2343  ;;  %v1501_v7 = vsel %vm319_vm0, %v2976_v53, 0.0  ;;  %2357 = vpow2.f32 %v1703_v63  ;;  %v1307_v35 = vpack.c.bf16 %v2912_v33, %v2910_v31  ;;  %v1312_v22 = vrot.slane %v925_v27, 4 }
 0x528   : > { %v2988_v47 = vpop.eup %2345  ;;  %v1502_v19 = vadd.f32 %v1501_v7, %v1500_v28  ;;  %2359 = vpow2.f32 %v1705_v9  ;;  %2168 = vmatpush3.bf16.msra.mxu1 %v1090_v10  ;;  %v1503_v24 = vsel %vm319_vm0, %v2983_v40, 0.0  ;;  %v790_v10 = vpop.permute.xlu0 %789 }
 0x529   : > { %2361 = vpow2.f32 %v1707_v4  ;;  %2183 = vmatprep.subr.bf16.mxu1 %v2445_v0  ;;  %v2994_v8 = vpop.eup %2347  ;;  %v1505_v14 = vsel %vm319_vm0, %v2988_v47, 0.0  ;;  %v1522_v7 = vpack.c.bf16 %v2988_v47, %v2983_v40  ;;  %v2303_v40 = vld [vmem:[%s3133_s5] sm:$0xff]   ;;  %v1084_v47 = vrot.slane %v2957_v52, 4 }
 0x52a   : > { %v1504_v38 = vadd.f32 %v1503_v24, %v1502_v19  ;;  %2363 = vpow2.f32 %v1709_v56  ;;  %v2350_v17 = vpop.eup %2349  ;;  %v1507_v50 = vsel %vm319_vm0, %v2994_v8, 0.0  ;;  %v785_v56 = vpop.permute.xlu1 %784  ;;  %v1521_v19 = vpack.c.bf16 %v2976_v53, %v2972_v48  ;;  %2243 = vmatprep.mubr.msk.bf16.mxu0 %vm348_vm2, %v2303_v40 }
 0x52b   : > { %2170 = vmatmul.mubr.msk.bf16.vlgmr.msra.gmra.mxu1 %vm319_vm0, %v925_v27  ;;  %2365 = vpow2.f32 %v1711_v23  ;;  %v1509_v39 = vsel %vm319_vm0, %v2350_v17, 0.0  ;;  %v1523_v60 = vpack.c.bf16 %v2350_v17, %v2994_v8  ;;  %v918_v27 = vadd.f32 %v2722_v18, %v790_v10 }
 0x52c   : > { %v1506_v1 = vadd.f32 %v1505_v14, %v1504_v38  ;;  %2184 = vmatpush3.bf16.msra.mxu1 %v1310_v12  ;;  %2191 = vmatprep.mubr.msk.bf16.mxu1 %vm2446_vm1, %v2445_v0  ;;  %v2352_v42 = vpop.eup %2351  ;;  %2367 = vpow2.f32 %v1713_v15  ;;  %v915_v24 = vadd.f32 %v2718_v2, %v785_v56  ;;  %v1085_v8 = vadd.f32 %v1084_v47, %v2957_v52 }
 0x52d   : > { %2185 = vmatprep.subr.bf16.mxu1 %v2445_v0  ;;  %v2354_v30 = vpop.eup %2353  ;;  %v1511_v16 = vsel %vm319_vm0, %v2352_v42, 0.0  ;;  %2369 = vpow2.f32 %v1715_v3 }
 0x52e   : > { %v1508_v57 = vadd.f32 %v1507_v50, %v1506_v1  ;;  %v1513_v46 = vsel %vm319_vm0, %v2354_v30, 0.0  ;;  %v1524_v59 = vpack.c.bf16 %v2354_v30, %v2352_v42  ;;  %v926_v23 = vpack.c.bf16 %v918_v27, %v915_v24  ;;  %v2304_v27 = vld [vmem:[%s3133_s5 + $0x8] sm:$0xff]   ;;  %v1804_v24 = vpop.permute.xlu0 %1803 }
 0x52f   : > { %v1086_v38 = vrot.slane %v1085_v8, 2 }
 0x530   : > { %v1510_v43 = vadd.f32 %v1509_v39, %v1508_v57  ;;  %2186 = vmatpush3.bf16.msra.mxu1 %v1309_v34  ;;  %v1743_v53 = vrot.slane %v926_v23, 4 }
 0x531   : > { %2187 = vmatprep.subr.bf16.mxu1 %v2445_v0  ;;  %v1087_v12 = vadd.f32 %v1086_v38, %v1085_v8  ;;  %v2380_v38 = vld [vmem:[%s2546_s17] sm:$0xff] }
 0x532   : > { %v1512_v44 = vadd.f32 %v1511_v16, %v1510_v43  ;;  %v1814_v47 = vpop.permute.xlu0 %1813 }
 0x533   : > { %v2356_v45 = vpop.eup %2355  ;;  %v1088_v14 = vrot.slane %v1087_v12, 1 }
 0x534   : > { %v2358_v51 = vpop.eup %2357  ;;  %v1717_v58 = vsel %vm319_vm0, %v2356_v45, 0.0  ;;  %2188 = vmatpush3.bf16.msra.mxu1 %v1308_v26  ;;  %v3015_v62 = vadd.f32 %v1513_v46, %v1512_v44 }
 0x535   : > { %v2360_v54 = vpop.eup %2359  ;;  %v1718_v55 = vsel %vm319_vm0, %v2358_v51, 0.0  ;;  %2189 = vmatprep.subr.bf16.mxu1 %v2445_v0  ;;  %v1738_v2 = vpack.c.bf16 %v2358_v51, %v2356_v45  ;;  %v1089_v15 = vadd.f32 %v1088_v14, %v1087_v12 }
 0x536   : > { %v2362_v21 = vpop.eup %2361  ;;  %v1719_v25 = vadd.f32 %v1718_v55, %v1717_v58  ;;  %v1720_v41 = vsel %vm319_vm0, %v2360_v54, 0.0  ;;  %v1515_v42 = vrot.slane %v3015_v62, 4 }
 0x537   : > { %v2364_v49 = vpop.eup %2363  ;;  %v1722_v32 = vsel %vm319_vm0, %v2362_v21, 0.0  ;;  %v1739_v48 = vpack.c.bf16 %v2362_v21, %v2360_v54  ;;  %2371 = vrcp.f32 %v1089_v15  ;;  %v2381_v15 = vld [vmem:[%s2546_s17 + $0x18] sm:$0xff] }
 0x538   : > { %v1721_v11 = vadd.f32 %v1720_v41, %v1719_v25  ;;  %2190 = vmatpush3.bf16.msra.mxu1 %v1307_v35  ;;  %v2366_v6 = vpop.eup %2365  ;;  %v1724_v20 = vsel %vm319_vm0, %v2364_v49, 0.0  ;;  %v1516_v34 = vadd.f32 %v1515_v42, %v3015_v62 }
 0x539   : > { %2205 = vmatprep.subr.bf16.mxu1 %v2445_v0  ;;  %v2368_v61 = vpop.eup %2367  ;;  %v1726_v31 = vsel %vm319_vm0, %v2366_v6, 0.0  ;;  %v1740_v18 = vpack.c.bf16 %v2366_v6, %v2364_v49 }
 0x53a   : > { %v1723_v13 = vadd.f32 %v1722_v32, %v1721_v11  ;;  %v2370_v33 = vpop.eup %2369  ;;  %v1728_v4 = vsel %vm319_vm0, %v2368_v61, 0.0  ;;  %v1517_v16 = vrot.slane %v1516_v34, 2 }
 0x53b   : > { %2192 = vmatmul.mubr.msk.bf16.vlgmr.msra.gmra.mxu1 %vm319_vm0, %v1312_v22  ;;  %v1730_v28 = vsel %vm319_vm0, %v2370_v33, 0.0  ;;  %v1741_v29 = vpack.c.bf16 %v2370_v33, %v2368_v61 }
 0x53c   : > { %v1725_v63 = vadd.f32 %v1724_v20, %v1723_v13  ;;  %2206 = vmatpush3.bf16.msra.mxu1 %v1524_v59  ;;  %2213 = vmatprep.mubr.msk.bf16.mxu1 %vm2446_vm1, %v2445_v0 }
 0x53d   : > { %2207 = vmatprep.subr.bf16.mxu1 %v2445_v0 }
 0x53e   : > { %v1727_v9 = vadd.f32 %v1726_v31, %v1725_v63 }
 0x540   : > { %v1729_v5 = vadd.f32 %v1728_v4, %v1727_v9  ;;  %2208 = vmatpush3.bf16.msra.mxu1 %v1523_v60 }
 0x541   : > { %2209 = vmatprep.subr.bf16.mxu1 %v2445_v0 }
 0x542   : > { %v1731_v37 = vadd.f32 %v1730_v28, %v1729_v5 }
 0x544   : > { %2210 = vmatpush3.bf16.msra.mxu1 %v1522_v7  ;;  %v2372_v39 = vpop.eup %2371  ;;  %v1732_v46 = vrot.slane %v1731_v37, 4 }
 0x545   : > { %2211 = vmatprep.subr.bf16.mxu1 %v2445_v0 }
 0x546   : > { %v1733_v58 = vadd.f32 %v1732_v46, %v1731_v37 }
 0x548   : > { %2212 = vmatpush3.bf16.msra.mxu1 %v1521_v19  ;;  %v1734_v62 = vrot.slane %v1733_v58, 2  ;;  %v1799_v19 = vpop.permute.xlu1 %1798 }
 0x549   : > { %2227 = vmatprep.subr.bf16.mxu1 %v2445_v0 }
 0x54a   : > { %v1735_v49 = vadd.f32 %v1734_v62, %v1733_v58 }
 0x54b   : > { %2214 = vmatmul.mubr.msk.bf16.vlgmr.msra.gmra.mxu1 %vm319_vm0, %v926_v23 }
 0x54c   : > { %2228 = vmatpush3.bf16.msra.mxu1 %v1741_v29  ;;  %2235 = vmatprep.mubr.msk.bf16.mxu1 %vm2446_vm1, %v2445_v0  ;;  %v1736_v11 = vrot.slane %v1735_v49, 1  ;;  %v1809_v23 = vpop.permute.xlu1 %1808 }
 0x54d   : > { %2229 = vmatprep.subr.bf16.mxu1 %v2445_v0 }
 0x54e   : > { %v1737_v22 = vadd.f32 %v1736_v11, %v1735_v49 }
 0x550   : > { %2230 = vmatpush3.bf16.msra.mxu1 %v1740_v18 }
 0x551   : > { %2231 = vmatprep.subr.bf16.mxu1 %v2445_v0 }
 0x554   : > { %2232 = vmatpush3.bf16.msra.mxu1 %v1739_v48 }
 0x555   : > { %2233 = vmatprep.subr.bf16.mxu1 %v2445_v0  ;;  %v1301_v0 = vrot.slane %v2961_v36, 4 }
 0x557   : > { %v1302_v17 = vadd.f32 %v1301_v0, %v2961_v36  ;;  %v1518_v36 = vadd.f32 %v1517_v16, %v1516_v34 }
 0x558   : > { %2234 = vmatpush3.bf16.msra.mxu1 %v1738_v2  ;;  %v2379_v2 = vld [vmem:[%s2546_s17 + $0x10] sm:$0xff] }
 0x559   : > { %v1303_v1 = vrot.slane %v1302_v17, 2  ;;  %v1519_v45 = vrot.slane %v1518_v36, 1 }
 0x55b   : > { %2236 = vmatmul.mubr.msk.bf16.vlgmr.msra.gmra.mxu1 %vm319_vm0, %v1743_v53  ;;  %v1304_v50 = vadd.f32 %v1303_v1, %v1302_v17  ;;  %v1520_v51 = vadd.f32 %v1519_v45, %v1518_v36 }
 0x55d   : > { %v1305_v3 = vrot.slane %v1304_v50, 1 }
 0x55f   : > { %v1306_v57 = vadd.f32 %v1305_v3, %v1304_v50  ;;  %v2382_v50 = vld [vmem:[%s2546_s17 + $0x8] sm:$0xff] }
 0x561   : > { %2373 = vrcp.f32 %v1306_v57 }
 0x562   : > { %2375 = vrcp.f32 %v1520_v51 }
 0x563   : > { %2377 = vrcp.f32 %v1737_v22 }
 0x56e   : > { %v2374_v54 = vpop.eup %2373 }
 0x56f   : > { %v2376_v32 = vpop.eup %2375 }
 0x570   : > { %v2378_v63 = vpop.eup %2377 }
 0x5eb   : > { %v1131_v30 = vpop.f32.mrf.mxu1 }
 0x5ec   : > { %v1138_v52 = vmul.f32 %v2372_v39, %v1131_v30 }
 0x5ed   : > { %v2171_v43 = vpop.f32.mrf.mxu1 }
 0x5ee   : > { %1139 = vst.msk [vmem:[#allocation2] sm:$0xff] %vm319_vm0, %v1138_v52 }
 0x5ef   : > { %v1134_v44 = vpop.f32.mrf.mxu1 }
 0x5f1   : > { %v2172_v26 = vpop.f32.mrf.mxu1 }
 0x5f5   : > { %v1790_v37 = vld [vmem:[#allocation2] sm:$0xff] }
 0x5fb   : > { %v1350_v55 = vpop.f32.mrf.mxu1 }
 0x5fc   : > { %v1357_v21 = vmul.f32 %v2374_v54, %v1350_v55 }
 0x5fd   : > { %v2193_v25 = vpop.f32.mrf.mxu1 }
 0x5fe   : > { %1358 = vst.msk [vmem:[#allocation2 + $0x8] sm:$0xff] %vm319_vm0, %v1357_v21 }
 0x5ff   : > { %v1353_v35 = vpop.f32.mrf.mxu1 }
 0x601   : > { %v2194_v41 = vpop.f32.mrf.mxu1 }
 0x605   : > { %v1791_v10 = vld [vmem:[#allocation2 + $0x8] sm:$0xff] }
 0x606   : > { %v1794_v56 = vpack.c.bf16 %v1791_v10, %v1790_v37 }
 0x60b   : > { %v1562_v6 = vpop.f32.mrf.mxu1 }
 0x60c   : > { %v1569_v13 = vmul.f32 %v2376_v32, %v1562_v6 }
 0x60d   : > { %v2215_v59 = vpop.f32.mrf.mxu1 }
 0x60e   : > { %1570 = vst.msk [vmem:[#allocation2 + $0x10] sm:$0xff] %vm319_vm0, %v1569_v13 }
 0x60f   : > { %v1565_v20 = vpop.f32.mrf.mxu1 }
 0x611   : > { %v2216_v61 = vpop.f32.mrf.mxu1 }
 0x615   : > { %v1792_v5 = vld [vmem:[#allocation2 + $0x10] sm:$0xff] }
 0x61b   : > { %v1781_v31 = vpop.f32.mrf.mxu1 }
 0x61c   : > { %v1788_v33 = vmul.f32 %v2378_v63, %v1781_v31 }
 0x61d   : > { %v2237_v9 = vpop.f32.mrf.mxu1 }
 0x61e   : > { %1789 = vst.msk [vmem:[#allocation2 + $0x18] sm:$0xff] %vm319_vm0, %v1788_v33 }
 0x61f   : > { %v1784_v60 = vpop.f32.mrf.mxu1 }
 0x621   : > { %v2238_v4 = vpop.f32.mrf.mxu1 }
 0x625   : > { %v1793_v28 = vld [vmem:[#allocation2 + $0x18] sm:$0xff] }
 0x626   : > { %v1795_v7 = vpack.c.bf16 %v1793_v28, %v1792_v5 }
 0x628   : > { %2239 = vmatprep.subr.bf16.mxu0 %v1795_v7 }
 0x629   : > { %2240 = vmatpush3.bf16.msra.mxu0 %v1795_v7 }
 0x62a   : > { %2241 = vmatprep.subr.bf16.mxu0 %v1794_v56 }
 0x62d   : > { %2242 = vmatpush3.bf16.msra.mxu0 %v1794_v56 }
 0x630   : > { %2244 = vmatmul.mubr.msk.bf16.vlgmr.msra.gmra.mxu0 %vm348_vm2, %v2304_v27 }
 0x6f0   : > { %v2245_v29 = vpop.f32.mrf.mxu0 }
 0x6f1   : > { %v1875_v18 = vadd.f32 %v2245_v29, %v1809_v23 }
 0x6f2   : > { %v1866_v48 = vpop.f32.mrf.mxu0 }
 0x6f3   : > { %v1883_v53 = vadd.f32 %v2379_v2, %v1875_v18  ;;  %v1867_v40 = vadd.f32 %v1866_v48, %v1799_v19 }
 0x6f4   : > { %v2246_v8 = vpop.f32.mrf.mxu0 }
 0x6f5   : > { %1887 = vst.msk [vmem:[%s271_s9 + $0x10] sm:$0xff] %vm319_vm0, %v1883_v53  ;;  %v1881_v12 = vadd.f32 %v2380_v38, %v1867_v40  ;;  %v1878_v14 = vadd.f32 %v2246_v8, %v1814_v47 }
 0x6f6   : > { %v1869_v0 = vpop.f32.mrf.mxu0 }
 0x6f7   : > { %1885 = vst.msk [vmem:[%s271_s9] sm:$0xff] %vm319_vm0, %v1881_v12  ;;  %v1884_v17 = vadd.f32 %v2381_v15, %v1878_v14  ;;  %v1870_v1 = vadd.f32 %v1869_v0, %v1804_v24 }
 0x6f9   : > { %1888 = vst.msk [vmem:[%s271_s9 + $0x18] sm:$0xff] %vm319_vm0, %v1884_v17  ;;  %v1882_v3 = vadd.f32 %v2382_v50, %v1870_v1 }
 0x6fb   : > { %1886 = vst.msk [vmem:[%s271_s9 + $0x8] sm:$0xff] %vm319_vm0, %v1882_v3 }
 0x6fc   : > { %2396 = shalt.err (!%p2393_p3)
}
 0x6fd   : > { %s2397_s17 = scalar_lea.hbm %s3079_s18, 512  ;;  %s2401_s8 = scalar_lea.hbm %s3135_s7, 1024 }
 0x6fe   : > { %p2398_p4 = scmp.ne.s32.totalorder %s3079_s18, %s2397_s17  ;;  %p2402_p9 = scmp.lt.s32.totalorder %s3079_s18, %s3135_s7 }
 0x6ff   : > { %p2403_p10 = scmp.lt.s32.totalorder %s2401_s8, %s2397_s17 }
 0x700   : > { %p2399_p7 = pnand %p2398_p4, %p2529_p5 }
 0x701   : > { %p2404_p11 = por %p2403_p10, %p2402_p9 }
 0x702   : > { %p2400_p8 = pneg %p2399_p7 }
 0x704   : > { %p2405_p12 = pnand %p2404_p11, %p2400_p8 }
 0x706   : > { %2408 = shalt.err (!%p2405_p12)
}
 0x707   : > { %s2449_s15 = smov 128   ;;  %s2450_s16 = smov 8  }
 0x708   : > { %2251 = dma.vmem_to_hbm [thread:$0]  (%p2529_p5), %s3081_s13, 512, %s3079_s18, %s3088_s28, %s2449_s15, %s2449_s15, %s2450_s16  }
 0x709 PF: > { %p2257_p13 = scmp.ge.s32.totalorder %s2443_s27, 2  ;;  %s1918_s19 = sand.u32 1, %s2431_s24  }
 0x70a   : > { %s1919_s20 = scalar_lea.sflag [#allocation4], %s1918_s19 }
 0x70b   : > { %p2254_p0 = pnand %p2257_p13, %p2533_p6 }
 0x70d   : > { %p2255_p1 = pneg %p2254_p0 }
 0x70f   : > { %2426 = dma.done.wait (%p2255_p1), %s1919_s20, 512  }
 0x710   : > { %2428 = vsyncadd (%p2255_p1), %s1919_s20, 4294966784  ;;  %p17_p2 = scmp.ge.s32.totalorder %s2516_s30, 4   ;;  %s3138_s24 = smov %s2435_s25 }
 0x711   : > { %s3139_s25 = smov %s2439_s26  ;;  %s3140_s26 = smov %s2527_s10 }
 0x712   : > { %s3141_s27 = smov %s2516_s30  ;;  %19 = sbr.rel (!%p17_p2) target bundleno = 3 (0x3), region = 83 }
 0x717   :  { %1924 = vsyncpa [#allocation4], 1 }
 0x718   :  { %1926 = vsyncpa [#allocation4 + $0x1], 1 }

</bundles_post_ra>
